<compile_context>
chip_gen: v7x
topology: tpu7x:2x2x1
jax: 0.10.0
libtpu: 0.0.40
codegen_flags: <defaults>
</compile_context>

<pallas_src>
import jax
import jax.numpy as jnp
from jax import lax
from jax.experimental import pallas as pl
from jax.experimental.pallas import tpu as pltpu

DIM = 32            # hidden / embedding dim
GP = 128            # per-gate lane padding (vreg lane width)
NUM_OPS = 10
NUM_HOSTS = 20
OP_ROWS = 16        # NUM_OPS padded to bf16 sublane-pack multiple (16)
HOST_ROWS = 32      # NUM_HOSTS padded likewise
EPS = 1e-5


def mlp_predictor_forward(ops, host, params):
    """ops: (B, T) int op ids; host: (B,) int host ids; returns (B,) scores."""
    B, T = ops.shape
    BP = ((B + 7) // 8) * 8          # sublane-aligned batch rows used everywhere in-kernel
    dim, gp = DIM, GP
    f32, bf16 = jnp.float32, jnp.bfloat16

    # ---- tiny int32 glue only: one packed id block -----------------------------------
    # rows [0, T*BP): time-major op ids (batch padded to BP with id 0)
    # rows [T*BP, (T+1)*BP): host ids (batch padded with id 0)
    ops_tm = jnp.transpose(ops.astype(jnp.int32), (1, 0))              # (T, B)
    ops_tm = jnp.pad(ops_tm, ((0, 0), (0, BP - B)))                    # (T, BP)
    host_p = jnp.pad(host.astype(jnp.int32).reshape(1, B), ((0, 0), (0, BP - B)))
    ids = jnp.concatenate([ops_tm, host_p], axis=0).reshape((T + 1) * BP, 1)

    def kernel(ids_ref, gates_ref, head_ref, vec_ref, out_ref):
        # ---- carve the packed slabs with static slices (no extra DMAs) ----------------
        op_tab = gates_ref[0:OP_ROWS, :]                    # (16, 3*gp) bf16 fused table
        w_hh = gates_ref[OP_ROWS:OP_ROWS + gp, :]           # (gp, 3*gp) bf16

        host_tab = head_ref[0:HOST_ROWS, :]                 # (32, gp) bf16 fused table
        w1_h = head_ref[HOST_ROWS:HOST_ROWS + gp, :]        # (gp, gp) bf16
        w2 = head_ref[HOST_ROWS + gp:HOST_ROWS + 2 * gp, :]     # (gp, gp) bf16
        w3 = head_ref[HOST_ROWS + 2 * gp:HOST_ROWS + 3 * gp, :]  # (gp, gp) bf16

        b_hh_n = vec_ref[0:1, :]                            # (1, gp) f32
        g1 = vec_ref[1:2, :]
        be1 = vec_ref[2:3, :]
        b2 = vec_ref[3:4, :]
        g2 = vec_ref[4:5, :]
        be2 = vec_ref[5:6, :]
        b3 = vec_ref[6:7, :]

        # ---- embedding gather fused with the input projection (one-hot @ fused table) --
        op_ids = ids_ref[0:T * BP, :]                                               # (T*BP, 1)
        op_oh = jnp.where(
            op_ids == lax.broadcasted_iota(jnp.int32, (T * BP, OP_ROWS), 1),
            1.0, 0.0).astype(bf16)
        gi_all = jnp.dot(op_oh, op_tab, preferred_element_type=f32)                 # (T*BP, 3*gp)

        host_ids = ids_ref[T * BP:(T + 1) * BP, :]                                  # (BP, 1)
        host_oh = jnp.where(
            host_ids == lax.broadcasted_iota(jnp.int32, (BP, HOST_ROWS), 1),
            1.0, 0.0).astype(bf16)
        host_term = jnp.dot(host_oh, host_tab, preferred_element_type=f32)          # (BP, gp)

        # ---- GRU recurrence (num_layers=1, h0=0), fully unrolled, bf16 h carry --------
        # gi already contains b_ih + b_hh_{r,z}; only b_hh_n stays in-loop (inside r*(.)).
        # Gate padded lanes stay exactly 0 every step (padded weight/bias cols are 0).
        h = jnp.zeros((BP, gp), bf16)
        for t in range(T):
            gi = gi_all[t * BP:(t + 1) * BP, :]                                     # 8-row static slice
            gh = jnp.dot(h, w_hh, preferred_element_type=f32)                       # (BP, 3*gp)
            r = jax.nn.sigmoid(gi[:, 0:gp] + gh[:, 0:gp])
            z = jax.nn.sigmoid(gi[:, gp:2 * gp] + gh[:, gp:2 * gp])
            n = jnp.tanh(gi[:, 2 * gp:3 * gp] + r * (gh[:, 2 * gp:3 * gp] + b_hh_n))
            h = ((1.0 - z) * n + z * h).astype(bf16)

        # ---- BatchNorm1d with per-batch stats, masked to the real B rows --------------
        rmask = jnp.where(lax.broadcasted_iota(jnp.int32, (BP, gp), 0) < B, 1.0, 0.0)
        inv_b = 1.0 / float(B)

        def batchnorm(x, gamma, beta):
            mu = jnp.sum(x * rmask, axis=0, keepdims=True) * inv_b
            d = (x - mu) * rmask
            var = jnp.sum(d * d, axis=0, keepdims=True) * inv_b
            return (x - mu) * lax.rsqrt(var + EPS) * gamma + beta

        # ---- score head; concat replaced by split first layer (b1 folded into host_tab) -
        h1 = jnp.dot(h, w1_h, preferred_element_type=f32) + host_term               # (BP, gp)
        h1 = jnp.maximum(h1, 0.0)
        h1 = batchnorm(h1, g1, be1)

        h2 = jnp.dot(h1.astype(bf16), w2, preferred_element_type=f32) + b2          # (BP, gp)
        h2 = jnp.maximum(h2, 0.0)
        h2 = batchnorm(h2, g2, be2)

        # lane-dense (BP, gp) store; only column 0 is the real score (w3/b3 zero-padded).
        out_ref[...] = jnp.dot(h2.astype(bf16), w3, preferred_element_type=f32) + b3

    vmem = pl.BlockSpec(memory_space=pltpu.MemorySpace.VMEM)
    out = pl.pallas_call(
        kernel,
        out_shape=jax.ShapeDtypeStruct((BP, gp), jnp.float32),
        in_specs=[vmem, vmem, vmem, vmem],
        out_specs=vmem,
    )(ids, params["gates"], params["head"], params["vec"])
    return out[:B, 0]                 # matches torch .squeeze(): (B,)


def init_params(key, dim=DIM, gp=GP):
    ks = jax.random.split(key, 12)

    def u(k, shape, fan_in):
        s = float(fan_in) ** -0.5
        return jax.random.uniform(k, shape, jnp.float32, -s, s)

    # Raw parameters with PyTorch-matching init distributions.
    op_embeds = jax.random.normal(ks[0], (NUM_OPS, dim), jnp.float32)     # Embedding ~ N(0,1)
    host_embeds = jax.random.normal(ks[1], (NUM_HOSTS, dim), jnp.float32)

    w_ih = u(ks[2], (dim, 3 * dim), dim)     # GRU, stored (in, out), gate order [r, z, n]
    w_hh = u(ks[3], (dim, 3 * dim), dim)
    b_ih = u(ks[4], (3 * dim,), dim)
    b_hh = u(ks[5], (3 * dim,), dim)

    w1 = u(ks[6], (2 * dim, 2 * dim), 2 * dim)   # Linear(2d, 2d), stored (in, out)
    b1 = u(ks[7], (2 * dim,), 2 * dim)
    w2 = u(ks[8], (2 * dim, dim), 2 * dim)
    b2 = u(ks[9], (dim,), 2 * dim)
    w3 = u(ks[10], (dim, 1), dim)
    b3 = u(ks[11], (1,), dim)

    # ---- fold embeddings + biases into downstream tables (once, in f32) ---------------
    b_hh_rz = jnp.concatenate([b_hh[:2 * dim], jnp.zeros((dim,), jnp.float32)])
    op_gi = op_embeds @ w_ih + b_ih + b_hh_rz                 # (10, 3*dim)
    host_h1 = host_embeds @ w1[dim:] + b1                     # (20, 2*dim)
    w1_h = w1[:dim]                                           # (dim, 2*dim)

    def pad_gate_cols(w, rows_out):                           # (rows, 3*dim) -> (rows_out, 3*gp)
        rows = w.shape[0]
        out = jnp.zeros((rows_out, 3 * gp), jnp.float32)
        for g in range(3):
            out = out.at[:rows, g * gp:g * gp + dim].set(w[:, g * dim:(g + 1) * dim])
        return out

    # ---- bf16 "gates" slab: fused op table (16 rows) + padded W_hh (128 rows) ----------
    gates = jnp.concatenate(
        [pad_gate_cols(op_gi, OP_ROWS), pad_gate_cols(w_hh, gp)], axis=0)   # (144, 3*gp)

    # ---- bf16 "head" slab: fused host table, W1_h, W2, W3 (all padded to gp lanes) -----
    head = jnp.zeros((HOST_ROWS + 3 * gp, gp), jnp.float32)
    head = head.at[0:NUM_HOSTS, 0:2 * dim].set(host_h1)
    head = head.at[HOST_ROWS:HOST_ROWS + dim, 0:2 * dim].set(w1_h)
    head = head.at[HOST_ROWS + gp:HOST_ROWS + gp + 2 * dim, 0:dim].set(w2)
    head = head.at[HOST_ROWS + 2 * gp:HOST_ROWS + 2 * gp + dim, 0:1].set(w3)

    # ---- f32 "vec" slab: remaining biases / BN gamma / beta, one (8, gp) tile ----------
    vec = jnp.zeros((8, gp), jnp.float32)
    vec = vec.at[0, 0:dim].set(b_hh[2 * dim:])                # b_hh_n (stays inside r*(.))
    vec = vec.at[1, 0:2 * dim].set(1.0)                       # gamma1
    # row 2: beta1 = 0
    vec = vec.at[3, 0:dim].set(b2)                            # b2
    vec = vec.at[4, 0:dim].set(1.0)                           # gamma2
    # row 5: beta2 = 0
    vec = vec.at[6, 0].set(b3[0])                             # b3
    # row 7: unused

    return {
        "gates": gates.astype(jnp.bfloat16),
        "head": head.astype(jnp.bfloat16),
        "vec": vec,
    }


if __name__ == "__main__":
    key = jax.random.PRNGKey(0)
    kp, ko, kh = jax.random.split(key, 3)
    params = init_params(kp)

    B, T = 4, 8
    ops = jax.random.randint(ko, (B, T), 0, NUM_OPS, dtype=jnp.int32)    # op-id sequence
    host = jax.random.randint(kh, (B,), 0, NUM_HOSTS, dtype=jnp.int32)   # host id

    fwd = jax.jit(mlp_predictor_forward)
    score = fwd(ops, host, params)
    jax.block_until_ready(score)
    assert score.shape == (B,)
    assert bool(jnp.all(jnp.isfinite(score)))
    print("KERNEL_OK")
</pallas_src>

<mosaic_0001>
module attributes {stable_mosaic.version = 11 : i64} {
  func.func @kernel(%arg0: memref<72x1xi32, #tpu.memory_space<vmem>>, %arg1: memref<144x384xbf16, #tpu.memory_space<vmem>>, %arg2: memref<416x128xbf16, #tpu.memory_space<vmem>>, %arg3: memref<8x128xf32, #tpu.memory_space<vmem>>, %arg4: memref<8x128xf32, #tpu.memory_space<vmem>>) attributes {dimension_semantics = [], scalar_prefetch = 0 : i64, scratch_operands = 0 : i64, tpu.core_type = #tpu.core_type<tc>} {
    %c0 = arith.constant 0 : index
    %c0_0 = arith.constant 0 : index
    %0 = vector.load %arg1[%c0, %c0_0] : memref<144x384xbf16, #tpu.memory_space<vmem>>, vector<16x384xbf16>
    %c16 = arith.constant 16 : index
    %c0_1 = arith.constant 0 : index
    %1 = vector.load %arg1[%c16, %c0_1] : memref<144x384xbf16, #tpu.memory_space<vmem>>, vector<128x384xbf16>
    %c0_2 = arith.constant 0 : index
    %c0_3 = arith.constant 0 : index
    %2 = vector.load %arg2[%c0_2, %c0_3] : memref<416x128xbf16, #tpu.memory_space<vmem>>, vector<32x128xbf16>
    %c32 = arith.constant 32 : index
    %c0_4 = arith.constant 0 : index
    %3 = vector.load %arg2[%c32, %c0_4] : memref<416x128xbf16, #tpu.memory_space<vmem>>, vector<128x128xbf16>
    %c160 = arith.constant 160 : index
    %c0_5 = arith.constant 0 : index
    %4 = vector.load %arg2[%c160, %c0_5] : memref<416x128xbf16, #tpu.memory_space<vmem>>, vector<128x128xbf16>
    %c288 = arith.constant 288 : index
    %c0_6 = arith.constant 0 : index
    %5 = vector.load %arg2[%c288, %c0_6] : memref<416x128xbf16, #tpu.memory_space<vmem>>, vector<128x128xbf16>
    %c0_7 = arith.constant 0 : index
    %c0_8 = arith.constant 0 : index
    %6 = vector.load %arg3[%c0_7, %c0_8] : memref<8x128xf32, #tpu.memory_space<vmem>>, vector<1x128xf32>
    %c1 = arith.constant 1 : index
    %c0_9 = arith.constant 0 : index
    %7 = vector.load %arg3[%c1, %c0_9] : memref<8x128xf32, #tpu.memory_space<vmem>>, vector<1x128xf32>
    %c2 = arith.constant 2 : index
    %c0_10 = arith.constant 0 : index
    %8 = vector.load %arg3[%c2, %c0_10] : memref<8x128xf32, #tpu.memory_space<vmem>>, vector<1x128xf32>
    %c3 = arith.constant 3 : index
    %c0_11 = arith.constant 0 : index
    %9 = vector.load %arg3[%c3, %c0_11] : memref<8x128xf32, #tpu.memory_space<vmem>>, vector<1x128xf32>
    %c4 = arith.constant 4 : index
    %c0_12 = arith.constant 0 : index
    %10 = vector.load %arg3[%c4, %c0_12] : memref<8x128xf32, #tpu.memory_space<vmem>>, vector<1x128xf32>
    %c5 = arith.constant 5 : index
    %c0_13 = arith.constant 0 : index
    %11 = vector.load %arg3[%c5, %c0_13] : memref<8x128xf32, #tpu.memory_space<vmem>>, vector<1x128xf32>
    %c6 = arith.constant 6 : index
    %c0_14 = arith.constant 0 : index
    %12 = vector.load %arg3[%c6, %c0_14] : memref<8x128xf32, #tpu.memory_space<vmem>>, vector<1x128xf32>
    %c0_15 = arith.constant 0 : index
    %c0_16 = arith.constant 0 : index
    %13 = vector.load %arg0[%c0_15, %c0_16] : memref<72x1xi32, #tpu.memory_space<vmem>>, vector<64x1xi32>
    %14 = tpu.iota {dimensions = array<i32: 1>} : vector<64x16xi32>
    %15 = vector.broadcast %13 : vector<64x1xi32> to vector<64x16xi32>
    %16 = arith.cmpi eq, %15, %14 : vector<64x16xi32>
    %cst = arith.constant 1.000000e+00 : f32
    %cst_17 = arith.constant 0.000000e+00 : f32
    %17 = vector.broadcast %cst : f32 to vector<64x16xf32>
    %18 = vector.broadcast %cst_17 : f32 to vector<64x16xf32>
    %19 = arith.select %16, %17, %18 : vector<64x16xi1>, vector<64x16xf32>
    %20 = arith.truncf %19 : vector<64x16xf32> to vector<64x16xbf16>
    %cst_18 = arith.constant dense<0.000000e+00> : vector<64x384xf32>
    %21 = tpu.matmul %20, %0, %cst_18 {dimension_numbers = #tpu.dot_dimension_numbers<[1], [0], [0], [1], [0, 0, 1, 1], [], []>} : vector<64x16xbf16>, vector<16x384xbf16>, vector<64x384xf32> -> vector<64x384xf32>
    %c64 = arith.constant 64 : index
    %c0_19 = arith.constant 0 : index
    %22 = vector.load %arg0[%c64, %c0_19] : memref<72x1xi32, #tpu.memory_space<vmem>>, vector<8x1xi32>
    %23 = tpu.iota {dimensions = array<i32: 1>} : vector<8x32xi32>
    %24 = vector.broadcast %22 : vector<8x1xi32> to vector<8x32xi32>
    %25 = arith.cmpi eq, %24, %23 : vector<8x32xi32>
    %cst_20 = arith.constant 1.000000e+00 : f32
    %cst_21 = arith.constant 0.000000e+00 : f32
    %26 = vector.broadcast %cst_20 : f32 to vector<8x32xf32>
    %27 = vector.broadcast %cst_21 : f32 to vector<8x32xf32>
    %28 = arith.select %25, %26, %27 : vector<8x32xi1>, vector<8x32xf32>
    %29 = arith.truncf %28 : vector<8x32xf32> to vector<8x32xbf16>
    %cst_22 = arith.constant dense<0.000000e+00> : vector<8x128xf32>
    %30 = tpu.matmul %29, %2, %cst_22 {dimension_numbers = #tpu.dot_dimension_numbers<[1], [0], [0], [1], [0, 0, 1, 1], [], []>} : vector<8x32xbf16>, vector<32x128xbf16>, vector<8x128xf32> -> vector<8x128xf32>
    %cst_23 = arith.constant 0.000000e+00 : bf16
    %31 = vector.broadcast %cst_23 : bf16 to vector<8x128xbf16>
    %32 = vector.extract_strided_slice %21 {offsets = [0, 0], sizes = [8, 384], strides = [1, 1]} : vector<64x384xf32> to vector<8x384xf32>
    %cst_24 = arith.constant dense<0.000000e+00> : vector<8x384xf32>
    %33 = tpu.matmul %31, %1, %cst_24 {dimension_numbers = #tpu.dot_dimension_numbers<[1], [0], [0], [1], [0, 0, 1, 1], [], []>} : vector<8x128xbf16>, vector<128x384xbf16>, vector<8x384xf32> -> vector<8x384xf32>
    %34 = vector.extract_strided_slice %32 {offsets = [0, 0], sizes = [8, 128], strides = [1, 1]} : vector<8x384xf32> to vector<8x128xf32>
    %35 = vector.extract_strided_slice %33 {offsets = [0, 0], sizes = [8, 128], strides = [1, 1]} : vector<8x384xf32> to vector<8x128xf32>
    %36 = arith.addf %34, %35 : vector<8x128xf32>
    %37 = arith.negf %36 : vector<8x128xf32>
    %38 = math.exp %37 : vector<8x128xf32>
    %cst_25 = arith.constant 1.000000e+00 : f32
    %39 = vector.broadcast %cst_25 : f32 to vector<8x128xf32>
    %40 = arith.addf %39, %38 : vector<8x128xf32>
    %41 = arith.divf %39, %40 : vector<8x128xf32>
    %42 = vector.extract_strided_slice %32 {offsets = [0, 128], sizes = [8, 128], strides = [1, 1]} : vector<8x384xf32> to vector<8x128xf32>
    %43 = vector.extract_strided_slice %33 {offsets = [0, 128], sizes = [8, 128], strides = [1, 1]} : vector<8x384xf32> to vector<8x128xf32>
    %44 = arith.addf %42, %43 : vector<8x128xf32>
    %45 = arith.negf %44 : vector<8x128xf32>
    %46 = math.exp %45 : vector<8x128xf32>
    %cst_26 = arith.constant 1.000000e+00 : f32
    %47 = vector.broadcast %cst_26 : f32 to vector<8x128xf32>
    %48 = arith.addf %47, %46 : vector<8x128xf32>
    %49 = arith.divf %47, %48 : vector<8x128xf32>
    %50 = vector.extract_strided_slice %32 {offsets = [0, 256], sizes = [8, 128], strides = [1, 1]} : vector<8x384xf32> to vector<8x128xf32>
    %51 = vector.extract_strided_slice %33 {offsets = [0, 256], sizes = [8, 128], strides = [1, 1]} : vector<8x384xf32> to vector<8x128xf32>
    %52 = vector.broadcast %6 : vector<1x128xf32> to vector<8x128xf32>
    %53 = arith.addf %51, %52 : vector<8x128xf32>
    %54 = arith.mulf %41, %53 : vector<8x128xf32>
    %55 = arith.addf %50, %54 : vector<8x128xf32>
    %56 = math.tanh %55 : vector<8x128xf32>
    %cst_27 = arith.constant 1.000000e+00 : f32
    %57 = vector.broadcast %cst_27 : f32 to vector<8x128xf32>
    %58 = arith.subf %57, %49 : vector<8x128xf32>
    %59 = arith.mulf %58, %56 : vector<8x128xf32>
    %60 = arith.extf %31 : vector<8x128xbf16> to vector<8x128xf32>
    %61 = arith.mulf %49, %60 : vector<8x128xf32>
    %62 = arith.addf %59, %61 : vector<8x128xf32>
    %63 = arith.truncf %62 : vector<8x128xf32> to vector<8x128xbf16>
    %64 = vector.extract_strided_slice %21 {offsets = [8, 0], sizes = [8, 384], strides = [1, 1]} : vector<64x384xf32> to vector<8x384xf32>
    %cst_28 = arith.constant dense<0.000000e+00> : vector<8x384xf32>
    %65 = tpu.matmul %63, %1, %cst_28 {dimension_numbers = #tpu.dot_dimension_numbers<[1], [0], [0], [1], [0, 0, 1, 1], [], []>} : vector<8x128xbf16>, vector<128x384xbf16>, vector<8x384xf32> -> vector<8x384xf32>
    %66 = vector.extract_strided_slice %64 {offsets = [0, 0], sizes = [8, 128], strides = [1, 1]} : vector<8x384xf32> to vector<8x128xf32>
    %67 = vector.extract_strided_slice %65 {offsets = [0, 0], sizes = [8, 128], strides = [1, 1]} : vector<8x384xf32> to vector<8x128xf32>
    %68 = arith.addf %66, %67 : vector<8x128xf32>
    %69 = arith.negf %68 : vector<8x128xf32>
    %70 = math.exp %69 : vector<8x128xf32>
    %cst_29 = arith.constant 1.000000e+00 : f32
    %71 = vector.broadcast %cst_29 : f32 to vector<8x128xf32>
    %72 = arith.addf %71, %70 : vector<8x128xf32>
    %73 = arith.divf %71, %72 : vector<8x128xf32>
    %74 = vector.extract_strided_slice %64 {offsets = [0, 128], sizes = [8, 128], strides = [1, 1]} : vector<8x384xf32> to vector<8x128xf32>
    %75 = vector.extract_strided_slice %65 {offsets = [0, 128], sizes = [8, 128], strides = [1, 1]} : vector<8x384xf32> to vector<8x128xf32>
    %76 = arith.addf %74, %75 : vector<8x128xf32>
    %77 = arith.negf %76 : vector<8x128xf32>
    %78 = math.exp %77 : vector<8x128xf32>
    %cst_30 = arith.constant 1.000000e+00 : f32
    %79 = vector.broadcast %cst_30 : f32 to vector<8x128xf32>
    %80 = arith.addf %79, %78 : vector<8x128xf32>
    %81 = arith.divf %79, %80 : vector<8x128xf32>
    %82 = vector.extract_strided_slice %64 {offsets = [0, 256], sizes = [8, 128], strides = [1, 1]} : vector<8x384xf32> to vector<8x128xf32>
    %83 = vector.extract_strided_slice %65 {offsets = [0, 256], sizes = [8, 128], strides = [1, 1]} : vector<8x384xf32> to vector<8x128xf32>
    %84 = vector.broadcast %6 : vector<1x128xf32> to vector<8x128xf32>
    %85 = arith.addf %83, %84 : vector<8x128xf32>
    %86 = arith.mulf %73, %85 : vector<8x128xf32>
    %87 = arith.addf %82, %86 : vector<8x128xf32>
    %88 = math.tanh %87 : vector<8x128xf32>
    %cst_31 = arith.constant 1.000000e+00 : f32
    %89 = vector.broadcast %cst_31 : f32 to vector<8x128xf32>
    %90 = arith.subf %89, %81 : vector<8x128xf32>
    %91 = arith.mulf %90, %88 : vector<8x128xf32>
    %92 = arith.extf %63 : vector<8x128xbf16> to vector<8x128xf32>
    %93 = arith.mulf %81, %92 : vector<8x128xf32>
    %94 = arith.addf %91, %93 : vector<8x128xf32>
    %95 = arith.truncf %94 : vector<8x128xf32> to vector<8x128xbf16>
    %96 = vector.extract_strided_slice %21 {offsets = [16, 0], sizes = [8, 384], strides = [1, 1]} : vector<64x384xf32> to vector<8x384xf32>
    %cst_32 = arith.constant dense<0.000000e+00> : vector<8x384xf32>
    %97 = tpu.matmul %95, %1, %cst_32 {dimension_numbers = #tpu.dot_dimension_numbers<[1], [0], [0], [1], [0, 0, 1, 1], [], []>} : vector<8x128xbf16>, vector<128x384xbf16>, vector<8x384xf32> -> vector<8x384xf32>
    %98 = vector.extract_strided_slice %96 {offsets = [0, 0], sizes = [8, 128], strides = [1, 1]} : vector<8x384xf32> to vector<8x128xf32>
    %99 = vector.extract_strided_slice %97 {offsets = [0, 0], sizes = [8, 128], strides = [1, 1]} : vector<8x384xf32> to vector<8x128xf32>
    %100 = arith.addf %98, %99 : vector<8x128xf32>
    %101 = arith.negf %100 : vector<8x128xf32>
    %102 = math.exp %101 : vector<8x128xf32>
    %cst_33 = arith.constant 1.000000e+00 : f32
    %103 = vector.broadcast %cst_33 : f32 to vector<8x128xf32>
    %104 = arith.addf %103, %102 : vector<8x128xf32>
    %105 = arith.divf %103, %104 : vector<8x128xf32>
    %106 = vector.extract_strided_slice %96 {offsets = [0, 128], sizes = [8, 128], strides = [1, 1]} : vector<8x384xf32> to vector<8x128xf32>
    %107 = vector.extract_strided_slice %97 {offsets = [0, 128], sizes = [8, 128], strides = [1, 1]} : vector<8x384xf32> to vector<8x128xf32>
    %108 = arith.addf %106, %107 : vector<8x128xf32>
    %109 = arith.negf %108 : vector<8x128xf32>
    %110 = math.exp %109 : vector<8x128xf32>
    %cst_34 = arith.constant 1.000000e+00 : f32
    %111 = vector.broadcast %cst_34 : f32 to vector<8x128xf32>
    %112 = arith.addf %111, %110 : vector<8x128xf32>
    %113 = arith.divf %111, %112 : vector<8x128xf32>
    %114 = vector.extract_strided_slice %96 {offsets = [0, 256], sizes = [8, 128], strides = [1, 1]} : vector<8x384xf32> to vector<8x128xf32>
    %115 = vector.extract_strided_slice %97 {offsets = [0, 256], sizes = [8, 128], strides = [1, 1]} : vector<8x384xf32> to vector<8x128xf32>
    %116 = vector.broadcast %6 : vector<1x128xf32> to vector<8x128xf32>
    %117 = arith.addf %115, %116 : vector<8x128xf32>
    %118 = arith.mulf %105, %117 : vector<8x128xf32>
    %119 = arith.addf %114, %118 : vector<8x128xf32>
    %120 = math.tanh %119 : vector<8x128xf32>
    %cst_35 = arith.constant 1.000000e+00 : f32
    %121 = vector.broadcast %cst_35 : f32 to vector<8x128xf32>
    %122 = arith.subf %121, %113 : vector<8x128xf32>
    %123 = arith.mulf %122, %120 : vector<8x128xf32>
    %124 = arith.extf %95 : vector<8x128xbf16> to vector<8x128xf32>
    %125 = arith.mulf %113, %124 : vector<8x128xf32>
    %126 = arith.addf %123, %125 : vector<8x128xf32>
    %127 = arith.truncf %126 : vector<8x128xf32> to vector<8x128xbf16>
    %128 = vector.extract_strided_slice %21 {offsets = [24, 0], sizes = [8, 384], strides = [1, 1]} : vector<64x384xf32> to vector<8x384xf32>
    %cst_36 = arith.constant dense<0.000000e+00> : vector<8x384xf32>
    %129 = tpu.matmul %127, %1, %cst_36 {dimension_numbers = #tpu.dot_dimension_numbers<[1], [0], [0], [1], [0, 0, 1, 1], [], []>} : vector<8x128xbf16>, vector<128x384xbf16>, vector<8x384xf32> -> vector<8x384xf32>
    %130 = vector.extract_strided_slice %128 {offsets = [0, 0], sizes = [8, 128], strides = [1, 1]} : vector<8x384xf32> to vector<8x128xf32>
    %131 = vector.extract_strided_slice %129 {offsets = [0, 0], sizes = [8, 128], strides = [1, 1]} : vector<8x384xf32> to vector<8x128xf32>
    %132 = arith.addf %130, %131 : vector<8x128xf32>
    %133 = arith.negf %132 : vector<8x128xf32>
    %134 = math.exp %133 : vector<8x128xf32>
    %cst_37 = arith.constant 1.000000e+00 : f32
    %135 = vector.broadcast %cst_37 : f32 to vector<8x128xf32>
    %136 = arith.addf %135, %134 : vector<8x128xf32>
    %137 = arith.divf %135, %136 : vector<8x128xf32>
    %138 = vector.extract_strided_slice %128 {offsets = [0, 128], sizes = [8, 128], strides = [1, 1]} : vector<8x384xf32> to vector<8x128xf32>
    %139 = vector.extract_strided_slice %129 {offsets = [0, 128], sizes = [8, 128], strides = [1, 1]} : vector<8x384xf32> to vector<8x128xf32>
    %140 = arith.addf %138, %139 : vector<8x128xf32>
    %141 = arith.negf %140 : vector<8x128xf32>
    %142 = math.exp %141 : vector<8x128xf32>
    %cst_38 = arith.constant 1.000000e+00 : f32
    %143 = vector.broadcast %cst_38 : f32 to vector<8x128xf32>
    %144 = arith.addf %143, %142 : vector<8x128xf32>
    %145 = arith.divf %143, %144 : vector<8x128xf32>
    %146 = vector.extract_strided_slice %128 {offsets = [0, 256], sizes = [8, 128], strides = [1, 1]} : vector<8x384xf32> to vector<8x128xf32>
    %147 = vector.extract_strided_slice %129 {offsets = [0, 256], sizes = [8, 128], strides = [1, 1]} : vector<8x384xf32> to vector<8x128xf32>
    %148 = vector.broadcast %6 : vector<1x128xf32> to vector<8x128xf32>
    %149 = arith.addf %147, %148 : vector<8x128xf32>
    %150 = arith.mulf %137, %149 : vector<8x128xf32>
    %151 = arith.addf %146, %150 : vector<8x128xf32>
    %152 = math.tanh %151 : vector<8x128xf32>
    %cst_39 = arith.constant 1.000000e+00 : f32
    %153 = vector.broadcast %cst_39 : f32 to vector<8x128xf32>
    %154 = arith.subf %153, %145 : vector<8x128xf32>
    %155 = arith.mulf %154, %152 : vector<8x128xf32>
    %156 = arith.extf %127 : vector<8x128xbf16> to vector<8x128xf32>
    %157 = arith.mulf %145, %156 : vector<8x128xf32>
    %158 = arith.addf %155, %157 : vector<8x128xf32>
    %159 = arith.truncf %158 : vector<8x128xf32> to vector<8x128xbf16>
    %160 = vector.extract_strided_slice %21 {offsets = [32, 0], sizes = [8, 384], strides = [1, 1]} : vector<64x384xf32> to vector<8x384xf32>
    %cst_40 = arith.constant dense<0.000000e+00> : vector<8x384xf32>
    %161 = tpu.matmul %159, %1, %cst_40 {dimension_numbers = #tpu.dot_dimension_numbers<[1], [0], [0], [1], [0, 0, 1, 1], [], []>} : vector<8x128xbf16>, vector<128x384xbf16>, vector<8x384xf32> -> vector<8x384xf32>
    %162 = vector.extract_strided_slice %160 {offsets = [0, 0], sizes = [8, 128], strides = [1, 1]} : vector<8x384xf32> to vector<8x128xf32>
    %163 = vector.extract_strided_slice %161 {offsets = [0, 0], sizes = [8, 128], strides = [1, 1]} : vector<8x384xf32> to vector<8x128xf32>
    %164 = arith.addf %162, %163 : vector<8x128xf32>
    %165 = arith.negf %164 : vector<8x128xf32>
    %166 = math.exp %165 : vector<8x128xf32>
    %cst_41 = arith.constant 1.000000e+00 : f32
    %167 = vector.broadcast %cst_41 : f32 to vector<8x128xf32>
    %168 = arith.addf %167, %166 : vector<8x128xf32>
    %169 = arith.divf %167, %168 : vector<8x128xf32>
    %170 = vector.extract_strided_slice %160 {offsets = [0, 128], sizes = [8, 128], strides = [1, 1]} : vector<8x384xf32> to vector<8x128xf32>
    %171 = vector.extract_strided_slice %161 {offsets = [0, 128], sizes = [8, 128], strides = [1, 1]} : vector<8x384xf32> to vector<8x128xf32>
    %172 = arith.addf %170, %171 : vector<8x128xf32>
    %173 = arith.negf %172 : vector<8x128xf32>
    %174 = math.exp %173 : vector<8x128xf32>
    %cst_42 = arith.constant 1.000000e+00 : f32
    %175 = vector.broadcast %cst_42 : f32 to vector<8x128xf32>
    %176 = arith.addf %175, %174 : vector<8x128xf32>
    %177 = arith.divf %175, %176 : vector<8x128xf32>
    %178 = vector.extract_strided_slice %160 {offsets = [0, 256], sizes = [8, 128], strides = [1, 1]} : vector<8x384xf32> to vector<8x128xf32>
    %179 = vector.extract_strided_slice %161 {offsets = [0, 256], sizes = [8, 128], strides = [1, 1]} : vector<8x384xf32> to vector<8x128xf32>
    %180 = vector.broadcast %6 : vector<1x128xf32> to vector<8x128xf32>
    %181 = arith.addf %179, %180 : vector<8x128xf32>
    %182 = arith.mulf %169, %181 : vector<8x128xf32>
    %183 = arith.addf %178, %182 : vector<8x128xf32>
    %184 = math.tanh %183 : vector<8x128xf32>
    %cst_43 = arith.constant 1.000000e+00 : f32
    %185 = vector.broadcast %cst_43 : f32 to vector<8x128xf32>
    %186 = arith.subf %185, %177 : vector<8x128xf32>
    %187 = arith.mulf %186, %184 : vector<8x128xf32>
    %188 = arith.extf %159 : vector<8x128xbf16> to vector<8x128xf32>
    %189 = arith.mulf %177, %188 : vector<8x128xf32>
    %190 = arith.addf %187, %189 : vector<8x128xf32>
    %191 = arith.truncf %190 : vector<8x128xf32> to vector<8x128xbf16>
    %192 = vector.extract_strided_slice %21 {offsets = [40, 0], sizes = [8, 384], strides = [1, 1]} : vector<64x384xf32> to vector<8x384xf32>
    %cst_44 = arith.constant dense<0.000000e+00> : vector<8x384xf32>
    %193 = tpu.matmul %191, %1, %cst_44 {dimension_numbers = #tpu.dot_dimension_numbers<[1], [0], [0], [1], [0, 0, 1, 1], [], []>} : vector<8x128xbf16>, vector<128x384xbf16>, vector<8x384xf32> -> vector<8x384xf32>
    %194 = vector.extract_strided_slice %192 {offsets = [0, 0], sizes = [8, 128], strides = [1, 1]} : vector<8x384xf32> to vector<8x128xf32>
    %195 = vector.extract_strided_slice %193 {offsets = [0, 0], sizes = [8, 128], strides = [1, 1]} : vector<8x384xf32> to vector<8x128xf32>
    %196 = arith.addf %194, %195 : vector<8x128xf32>
    %197 = arith.negf %196 : vector<8x128xf32>
    %198 = math.exp %197 : vector<8x128xf32>
    %cst_45 = arith.constant 1.000000e+00 : f32
    %199 = vector.broadcast %cst_45 : f32 to vector<8x128xf32>
    %200 = arith.addf %199, %198 : vector<8x128xf32>
    %201 = arith.divf %199, %200 : vector<8x128xf32>
    %202 = vector.extract_strided_slice %192 {offsets = [0, 128], sizes = [8, 128], strides = [1, 1]} : vector<8x384xf32> to vector<8x128xf32>
    %203 = vector.extract_strided_slice %193 {offsets = [0, 128], sizes = [8, 128], strides = [1, 1]} : vector<8x384xf32> to vector<8x128xf32>
    %204 = arith.addf %202, %203 : vector<8x128xf32>
    %205 = arith.negf %204 : vector<8x128xf32>
    %206 = math.exp %205 : vector<8x128xf32>
    %cst_46 = arith.constant 1.000000e+00 : f32
    %207 = vector.broadcast %cst_46 : f32 to vector<8x128xf32>
    %208 = arith.addf %207, %206 : vector<8x128xf32>
    %209 = arith.divf %207, %208 : vector<8x128xf32>
    %210 = vector.extract_strided_slice %192 {offsets = [0, 256], sizes = [8, 128], strides = [1, 1]} : vector<8x384xf32> to vector<8x128xf32>
    %211 = vector.extract_strided_slice %193 {offsets = [0, 256], sizes = [8, 128], strides = [1, 1]} : vector<8x384xf32> to vector<8x128xf32>
    %212 = vector.broadcast %6 : vector<1x128xf32> to vector<8x128xf32>
    %213 = arith.addf %211, %212 : vector<8x128xf32>
    %214 = arith.mulf %201, %213 : vector<8x128xf32>
    %215 = arith.addf %210, %214 : vector<8x128xf32>
    %216 = math.tanh %215 : vector<8x128xf32>
    %cst_47 = arith.constant 1.000000e+00 : f32
    %217 = vector.broadcast %cst_47 : f32 to vector<8x128xf32>
    %218 = arith.subf %217, %209 : vector<8x128xf32>
    %219 = arith.mulf %218, %216 : vector<8x128xf32>
    %220 = arith.extf %191 : vector<8x128xbf16> to vector<8x128xf32>
    %221 = arith.mulf %209, %220 : vector<8x128xf32>
    %222 = arith.addf %219, %221 : vector<8x128xf32>
    %223 = arith.truncf %222 : vector<8x128xf32> to vector<8x128xbf16>
    %224 = vector.extract_strided_slice %21 {offsets = [48, 0], sizes = [8, 384], strides = [1, 1]} : vector<64x384xf32> to vector<8x384xf32>
    %cst_48 = arith.constant dense<0.000000e+00> : vector<8x384xf32>
    %225 = tpu.matmul %223, %1, %cst_48 {dimension_numbers = #tpu.dot_dimension_numbers<[1], [0], [0], [1], [0, 0, 1, 1], [], []>} : vector<8x128xbf16>, vector<128x384xbf16>, vector<8x384xf32> -> vector<8x384xf32>
    %226 = vector.extract_strided_slice %224 {offsets = [0, 0], sizes = [8, 128], strides = [1, 1]} : vector<8x384xf32> to vector<8x128xf32>
    %227 = vector.extract_strided_slice %225 {offsets = [0, 0], sizes = [8, 128], strides = [1, 1]} : vector<8x384xf32> to vector<8x128xf32>
    %228 = arith.addf %226, %227 : vector<8x128xf32>
    %229 = arith.negf %228 : vector<8x128xf32>
    %230 = math.exp %229 : vector<8x128xf32>
    %cst_49 = arith.constant 1.000000e+00 : f32
    %231 = vector.broadcast %cst_49 : f32 to vector<8x128xf32>
    %232 = arith.addf %231, %230 : vector<8x128xf32>
    %233 = arith.divf %231, %232 : vector<8x128xf32>
    %234 = vector.extract_strided_slice %224 {offsets = [0, 128], sizes = [8, 128], strides = [1, 1]} : vector<8x384xf32> to vector<8x128xf32>
    %235 = vector.extract_strided_slice %225 {offsets = [0, 128], sizes = [8, 128], strides = [1, 1]} : vector<8x384xf32> to vector<8x128xf32>
    %236 = arith.addf %234, %235 : vector<8x128xf32>
    %237 = arith.negf %236 : vector<8x128xf32>
    %238 = math.exp %237 : vector<8x128xf32>
    %cst_50 = arith.constant 1.000000e+00 : f32
    %239 = vector.broadcast %cst_50 : f32 to vector<8x128xf32>
    %240 = arith.addf %239, %238 : vector<8x128xf32>
    %241 = arith.divf %239, %240 : vector<8x128xf32>
    %242 = vector.extract_strided_slice %224 {offsets = [0, 256], sizes = [8, 128], strides = [1, 1]} : vector<8x384xf32> to vector<8x128xf32>
    %243 = vector.extract_strided_slice %225 {offsets = [0, 256], sizes = [8, 128], strides = [1, 1]} : vector<8x384xf32> to vector<8x128xf32>
    %244 = vector.broadcast %6 : vector<1x128xf32> to vector<8x128xf32>
    %245 = arith.addf %243, %244 : vector<8x128xf32>
    %246 = arith.mulf %233, %245 : vector<8x128xf32>
    %247 = arith.addf %242, %246 : vector<8x128xf32>
    %248 = math.tanh %247 : vector<8x128xf32>
    %cst_51 = arith.constant 1.000000e+00 : f32
    %249 = vector.broadcast %cst_51 : f32 to vector<8x128xf32>
    %250 = arith.subf %249, %241 : vector<8x128xf32>
    %251 = arith.mulf %250, %248 : vector<8x128xf32>
    %252 = arith.extf %223 : vector<8x128xbf16> to vector<8x128xf32>
    %253 = arith.mulf %241, %252 : vector<8x128xf32>
    %254 = arith.addf %251, %253 : vector<8x128xf32>
    %255 = arith.truncf %254 : vector<8x128xf32> to vector<8x128xbf16>
    %256 = vector.extract_strided_slice %21 {offsets = [56, 0], sizes = [8, 384], strides = [1, 1]} : vector<64x384xf32> to vector<8x384xf32>
    %cst_52 = arith.constant dense<0.000000e+00> : vector<8x384xf32>
    %257 = tpu.matmul %255, %1, %cst_52 {dimension_numbers = #tpu.dot_dimension_numbers<[1], [0], [0], [1], [0, 0, 1, 1], [], []>} : vector<8x128xbf16>, vector<128x384xbf16>, vector<8x384xf32> -> vector<8x384xf32>
    %258 = vector.extract_strided_slice %256 {offsets = [0, 0], sizes = [8, 128], strides = [1, 1]} : vector<8x384xf32> to vector<8x128xf32>
    %259 = vector.extract_strided_slice %257 {offsets = [0, 0], sizes = [8, 128], strides = [1, 1]} : vector<8x384xf32> to vector<8x128xf32>
    %260 = arith.addf %258, %259 : vector<8x128xf32>
    %261 = arith.negf %260 : vector<8x128xf32>
    %262 = math.exp %261 : vector<8x128xf32>
    %cst_53 = arith.constant 1.000000e+00 : f32
    %263 = vector.broadcast %cst_53 : f32 to vector<8x128xf32>
    %264 = arith.addf %263, %262 : vector<8x128xf32>
    %265 = arith.divf %263, %264 : vector<8x128xf32>
    %266 = vector.extract_strided_slice %256 {offsets = [0, 128], sizes = [8, 128], strides = [1, 1]} : vector<8x384xf32> to vector<8x128xf32>
    %267 = vector.extract_strided_slice %257 {offsets = [0, 128], sizes = [8, 128], strides = [1, 1]} : vector<8x384xf32> to vector<8x128xf32>
    %268 = arith.addf %266, %267 : vector<8x128xf32>
    %269 = arith.negf %268 : vector<8x128xf32>
    %270 = math.exp %269 : vector<8x128xf32>
    %cst_54 = arith.constant 1.000000e+00 : f32
    %271 = vector.broadcast %cst_54 : f32 to vector<8x128xf32>
    %272 = arith.addf %271, %270 : vector<8x128xf32>
    %273 = arith.divf %271, %272 : vector<8x128xf32>
    %274 = vector.extract_strided_slice %256 {offsets = [0, 256], sizes = [8, 128], strides = [1, 1]} : vector<8x384xf32> to vector<8x128xf32>
    %275 = vector.extract_strided_slice %257 {offsets = [0, 256], sizes = [8, 128], strides = [1, 1]} : vector<8x384xf32> to vector<8x128xf32>
    %276 = vector.broadcast %6 : vector<1x128xf32> to vector<8x128xf32>
    %277 = arith.addf %275, %276 : vector<8x128xf32>
    %278 = arith.mulf %265, %277 : vector<8x128xf32>
    %279 = arith.addf %274, %278 : vector<8x128xf32>
    %280 = math.tanh %279 : vector<8x128xf32>
    %cst_55 = arith.constant 1.000000e+00 : f32
    %281 = vector.broadcast %cst_55 : f32 to vector<8x128xf32>
    %282 = arith.subf %281, %273 : vector<8x128xf32>
    %283 = arith.mulf %282, %280 : vector<8x128xf32>
    %284 = arith.extf %255 : vector<8x128xbf16> to vector<8x128xf32>
    %285 = arith.mulf %273, %284 : vector<8x128xf32>
    %286 = arith.addf %283, %285 : vector<8x128xf32>
    %287 = arith.truncf %286 : vector<8x128xf32> to vector<8x128xbf16>
    %288 = tpu.iota {dimensions = array<i32: 0>} : vector<8x128xi32>
    %c4_i32 = arith.constant 4 : i32
    %289 = vector.broadcast %c4_i32 : i32 to vector<8x128xi32>
    %290 = arith.cmpi slt, %288, %289 : vector<8x128xi32>
    %cst_56 = arith.constant 1.000000e+00 : f32
    %cst_57 = arith.constant 0.000000e+00 : f32
    %291 = vector.broadcast %cst_56 : f32 to vector<8x128xf32>
    %292 = vector.broadcast %cst_57 : f32 to vector<8x128xf32>
    %293 = arith.select %290, %291, %292 : vector<8x128xi1>, vector<8x128xf32>
    %cst_58 = arith.constant dense<0.000000e+00> : vector<8x128xf32>
    %294 = tpu.matmul %287, %3, %cst_58 {dimension_numbers = #tpu.dot_dimension_numbers<[1], [0], [0], [1], [0, 0, 1, 1], [], []>} : vector<8x128xbf16>, vector<128x128xbf16>, vector<8x128xf32> -> vector<8x128xf32>
    %295 = arith.addf %294, %30 : vector<8x128xf32>
    %cst_59 = arith.constant 0.000000e+00 : f32
    %296 = vector.broadcast %cst_59 : f32 to vector<8x128xf32>
    %297 = arith.maximumf %295, %296 : vector<8x128xf32>
    %298 = arith.mulf %297, %293 : vector<8x128xf32>
    %cst_60 = arith.constant dense<0.000000e+00> : vector<128xf32>
    %299 = vector.multi_reduction <add>, %298, %cst_60 [0] : vector<8x128xf32> to vector<128xf32>
    %300 = vector.shape_cast %299 : vector<128xf32> to vector<1x128xf32>
    %cst_61 = arith.constant 2.500000e-01 : f32
    %301 = vector.broadcast %cst_61 : f32 to vector<1x128xf32>
    %302 = arith.mulf %300, %301 : vector<1x128xf32>
    %303 = vector.broadcast %302 : vector<1x128xf32> to vector<8x128xf32>
    %304 = arith.subf %297, %303 : vector<8x128xf32>
    %305 = arith.mulf %304, %293 : vector<8x128xf32>
    %306 = arith.mulf %305, %305 : vector<8x128xf32>
    %cst_62 = arith.constant dense<0.000000e+00> : vector<128xf32>
    %307 = vector.multi_reduction <add>, %306, %cst_62 [0] : vector<8x128xf32> to vector<128xf32>
    %308 = vector.shape_cast %307 : vector<128xf32> to vector<1x128xf32>
    %cst_63 = arith.constant 2.500000e-01 : f32
    %309 = vector.broadcast %cst_63 : f32 to vector<1x128xf32>
    %310 = arith.mulf %308, %309 : vector<1x128xf32>
    %311 = vector.broadcast %302 : vector<1x128xf32> to vector<8x128xf32>
    %312 = arith.subf %297, %311 : vector<8x128xf32>
    %cst_64 = arith.constant 9.99999974E-6 : f32
    %313 = vector.broadcast %cst_64 : f32 to vector<1x128xf32>
    %314 = arith.addf %310, %313 : vector<1x128xf32>
    %315 = math.rsqrt %314 : vector<1x128xf32>
    %316 = vector.broadcast %315 : vector<1x128xf32> to vector<8x128xf32>
    %317 = arith.mulf %312, %316 : vector<8x128xf32>
    %318 = vector.broadcast %7 : vector<1x128xf32> to vector<8x128xf32>
    %319 = arith.mulf %317, %318 : vector<8x128xf32>
    %320 = vector.broadcast %8 : vector<1x128xf32> to vector<8x128xf32>
    %321 = arith.addf %319, %320 : vector<8x128xf32>
    %322 = arith.truncf %321 : vector<8x128xf32> to vector<8x128xbf16>
    %cst_65 = arith.constant dense<0.000000e+00> : vector<8x128xf32>
    %323 = tpu.matmul %322, %4, %cst_65 {dimension_numbers = #tpu.dot_dimension_numbers<[1], [0], [0], [1], [0, 0, 1, 1], [], []>} : vector<8x128xbf16>, vector<128x128xbf16>, vector<8x128xf32> -> vector<8x128xf32>
    %324 = vector.broadcast %9 : vector<1x128xf32> to vector<8x128xf32>
    %325 = arith.addf %323, %324 : vector<8x128xf32>
    %cst_66 = arith.constant 0.000000e+00 : f32
    %326 = vector.broadcast %cst_66 : f32 to vector<8x128xf32>
    %327 = arith.maximumf %325, %326 : vector<8x128xf32>
    %328 = arith.mulf %327, %293 : vector<8x128xf32>
    %cst_67 = arith.constant dense<0.000000e+00> : vector<128xf32>
    %329 = vector.multi_reduction <add>, %328, %cst_67 [0] : vector<8x128xf32> to vector<128xf32>
    %330 = vector.shape_cast %329 : vector<128xf32> to vector<1x128xf32>
    %cst_68 = arith.constant 2.500000e-01 : f32
    %331 = vector.broadcast %cst_68 : f32 to vector<1x128xf32>
    %332 = arith.mulf %330, %331 : vector<1x128xf32>
    %333 = vector.broadcast %332 : vector<1x128xf32> to vector<8x128xf32>
    %334 = arith.subf %327, %333 : vector<8x128xf32>
    %335 = arith.mulf %334, %293 : vector<8x128xf32>
    %336 = arith.mulf %335, %335 : vector<8x128xf32>
    %cst_69 = arith.constant dense<0.000000e+00> : vector<128xf32>
    %337 = vector.multi_reduction <add>, %336, %cst_69 [0] : vector<8x128xf32> to vector<128xf32>
    %338 = vector.shape_cast %337 : vector<128xf32> to vector<1x128xf32>
    %cst_70 = arith.constant 2.500000e-01 : f32
    %339 = vector.broadcast %cst_70 : f32 to vector<1x128xf32>
    %340 = arith.mulf %338, %339 : vector<1x128xf32>
    %341 = vector.broadcast %332 : vector<1x128xf32> to vector<8x128xf32>
    %342 = arith.subf %327, %341 : vector<8x128xf32>
    %cst_71 = arith.constant 9.99999974E-6 : f32
    %343 = vector.broadcast %cst_71 : f32 to vector<1x128xf32>
    %344 = arith.addf %340, %343 : vector<1x128xf32>
    %345 = math.rsqrt %344 : vector<1x128xf32>
    %346 = vector.broadcast %345 : vector<1x128xf32> to vector<8x128xf32>
    %347 = arith.mulf %342, %346 : vector<8x128xf32>
    %348 = vector.broadcast %10 : vector<1x128xf32> to vector<8x128xf32>
    %349 = arith.mulf %347, %348 : vector<8x128xf32>
    %350 = vector.broadcast %11 : vector<1x128xf32> to vector<8x128xf32>
    %351 = arith.addf %349, %350 : vector<8x128xf32>
    %352 = arith.truncf %351 : vector<8x128xf32> to vector<8x128xbf16>
    %cst_72 = arith.constant dense<0.000000e+00> : vector<8x128xf32>
    %353 = tpu.matmul %352, %5, %cst_72 {dimension_numbers = #tpu.dot_dimension_numbers<[1], [0], [0], [1], [0, 0, 1, 1], [], []>} : vector<8x128xbf16>, vector<128x128xbf16>, vector<8x128xf32> -> vector<8x128xf32>
    %354 = vector.broadcast %12 : vector<1x128xf32> to vector<8x128xf32>
    %355 = arith.addf %353, %354 : vector<8x128xf32>
    %c0_73 = arith.constant 0 : index
    %c0_74 = arith.constant 0 : index
    %356 = vector.load %arg4[%c0_73, %c0_74] : memref<8x128xf32, #tpu.memory_space<vmem>>, vector<8x128xf32>
    tpu.vector_store %arg4[%c0_73, %c0_74], %355 {strides = array<i32>} : memref<8x128xf32, #tpu.memory_space<vmem>>, vector<8x128xf32>,
    return
  }
}

</mosaic_0001>

<bundles_post_ra>
// kernel: mlp_predictor_forward.1
= control target key start
LH: loop header
LB: loop body
LE: loop exit
PB: predicated region body
PF: predicated region fallthrough
CT: control target
= control target key end

     0   :  { %9 = vsyncpa [#allocation3], 0  ;;  %s3006_s0 = inlined_call_operand.vmem [shape: s32[72,1], index: 0, kind: input, shape index: {}]   ;;  %s3007_s1 = inlined_call_operand.hbm [shape: bf16[144,384], index: 1, kind: input, shape index: {}]   ;;  %s3008_s2 = inlined_call_operand.hbm [shape: bf16[416,128], index: 2, kind: input, shape index: {}]   ;;  %s3009_s3 = inlined_call_operand.vmem [shape: f32[8,128], index: 3, kind: input, shape index: {}]   ;;  %s3010_s4 = inlined_call_operand.vmem [shape: f32[8,128], index: 4, kind: output, shape index: {}]  }
   0x1   :  { %10 = vsyncpa [#allocation5], 0  ;;  %s2391_s15 = smov [#allocation2]   ;;  %s2343_s19 = scalar_lea.hbm %s3007_s1, 3456 }
   0x2   :  { %s18_s16 = sshll.u32 %s2391_s15, 4  ;;  %p2344_p0 = scmp.ne.s32.totalorder %s3007_s1, %s2343_s19  ;;  %s19_s16 = int_to_ptr.vmem [resolvable:$true] %s18_s16 }
   0x3   :  { %p2347_p1 = scmp.lt.u32.totalorder %s2343_s19, %s3007_s1 }
   0x5   :  { %p2349_p2 = pnand %p2347_p1, %p2344_p0 }
   0x7   :  { %2352 = shalt.err (!%p2349_p2)
}
   0x8   :  { %s2353_s24 = scalar_lea.vmem %s19_s16, 3456  ;;  %p2358_p4 = scmp.lt.s32.totalorder %s19_s16, %s19_s16 }
   0x9   :  { %p2354_p3 = scmp.ne.s32.totalorder %s19_s16, %s2353_s24  ;;  %p2359_p5 = scmp.lt.s32.totalorder %s2353_s24, %s2353_s24 }
   0xb   :  { %p2360_p6 = por %p2359_p5, %p2358_p4 }
   0xd   :  { %p2361_p7 = pnand %p2360_p6, %p2354_p3 }
   0xf   :  { %2364 = shalt.err (!%p2361_p7)
}
  0x10   :  { %s2392_s25 = smov 192   ;;  %s2393_s26 = smov 12  }
  0x11   :  { %24 = dma.hbm_to_vmem [thread:$0]  %s3007_s1, 3456, %s19_s16, [#allocation3], %s2392_s25, %s2392_s25, %s2393_s26  }
  0x12   :  { %s2394_s29 = smov [#allocation4]   ;;  %s2365_s7 = scalar_lea.hbm %s3008_s2, 3328 }
  0x13   :  { %s30_s30 = sshll.u32 %s2394_s29, 4  ;;  %p2366_p8 = scmp.ne.s32.totalorder %s3008_s2, %s2365_s7  ;;  %s31_s30 = int_to_ptr.vmem [resolvable:$true] %s30_s30 }
  0x14   :  { %p2369_p9 = scmp.lt.u32.totalorder %s2365_s7, %s3008_s2 }
  0x16   :  { %p2371_p10 = pnand %p2369_p9, %p2366_p8 }
  0x18   :  { %2374 = shalt.err (!%p2371_p10)
}
  0x19   :  { %s2375_s12 = scalar_lea.vmem %s31_s30, 3328  ;;  %p2380_p12 = scmp.lt.s32.totalorder %s31_s30, %s31_s30 }
  0x1a   :  { %p2376_p11 = scmp.ne.s32.totalorder %s31_s30, %s2375_s12  ;;  %p2381_p13 = scmp.lt.s32.totalorder %s2375_s12, %s2375_s12 }
  0x1c   :  { %p2382_p0 = por %p2381_p13, %p2380_p12 }
  0x1e   :  { %p2383_p1 = pnand %p2382_p0, %p2376_p11 }
  0x20   :  { %2386 = shalt.err (!%p2383_p1)
}
  0x21   :  { %s2395_s1 = smov 64   ;;  %s2396_s13 = smov 4  }
  0x22   :  { %36 = dma.hbm_to_vmem [thread:$0]  %s3008_s2, 3328, %s31_s30, [#allocation5], %s2395_s1, %s2395_s1, %s2396_s13  }
  0x23   :  { %2387 = dma.done.wait [#allocation3], 3456  }
  0x24   :  { %2388 = vsyncadd [#allocation3], 4294963840 }
  0x25   :  { %2389 = dma.done.wait [#allocation5], 3328  }
  0x26   :  { %2390 = vsyncadd [#allocation5], 4294963968  ;;  %v3012_v0 = vmov 0   ;;  %v143_v1 = vld [vmem:[%s3006_s0 + $0x10] sm:$0xff]  ;;  %v141_v2 = vld [vmem:[%s3006_s0] sm:$0xff]  ;;  %v3014_v13 = vmov 0.0   ;;  %v3011_v15 = vlaneseq }
  0x27   :  { %2189 = vset.pattern.permute.xlu1 %v3012_v0  ;;  %2188 = vset.pattern.permute.xlu0 %v3012_v0  ;;  %v144_v3 = vld [vmem:[%s3006_s0 + $0x18] sm:$0xff]  ;;  %v142_v4 = vld [vmem:[%s3006_s0 + $0x8] sm:$0xff]  ;;  %v2190_v5 = vld [vmem:[#allocation2 + $0x4] ss:$12 sps:$4 sm:$0xff]   ;;  %vm211_vm4 = vcmask 130048   ;;  %vm2399_vm10 = vmmov 0  }
  0x28   :  { %256 = vmatprep.mubr.bf16.mxu0 %v3012_v0  ;;  %158 = vperm.xlu1 %2189, %v143_v1   ;;  %v146_v6 = vld [vmem:[%s3006_s0 + $0x28] sm:$0xff]  ;;  %v145_v7 = vld [vmem:[%s3006_s0 + $0x20] sm:$0xff]  ;;  %v148_v11 = vld [vmem:[%s3006_s0 + $0x38] sm:$0xff]  ;;  %v2484_v16 = vand.u32 127, %v3011_v15  ;;  %vm381_vm11 = vcmask 261120  }
  0x29   :  { %152 = vperm.xlu0 %2188, %v141_v2   ;;  %v2192_v8 = vld [vmem:[#allocation2] ss:$12 sps:$4 sm:$0xff]   ;;  %v2193_v9 = vld [vmem:[#allocation2 + $0x8] ss:$12 sps:$4 sm:$0xff]   ;;  %224 = vmatprep.subr.bf16.mxu0 %v2190_v5  ;;  %v2494_v25 = vld [vmem:[#allocation2 + $0x18] ss:$12 sps:$4 sm:$0xff]  }
  0x2a   :  { %225 = vmatpush1.bf16.msra.mxu0 %v2192_v8  ;;  %1937 = vmatprep.subr.bf16.mxu1 %v2193_v9  ;;  %v2470_v10 = vld [vmem:[#allocation2 + $0x1c] ss:$12 sps:$4 sm:$0xff]   ;;  %v147_v12 = vld [vmem:[%s3006_s0 + $0x30] sm:$0xff]  ;;  %v362_v14 = vld [vmem:[%s3006_s0 + $0x40] sm:$0xff] }
  0x2b   :  { %1938 = vmatpush3.bf16.msra.mxu1 %v2193_v9  ;;  %553 = vmatprep.subr.bf16.mxu0 %v2470_v10  ;;  %v2496_v28 = vld [vmem:[#allocation2 + $0x34] ss:$12 sps:$4 sm:$0xff]   ;;  %v2203_v31 = vld [vmem:[#allocation4] sm:$0xff]   ;;  %v2522_v44 = vld [vmem:[#allocation2 + $0x64] ss:$12 sps:$4 sm:$0xff]  }
  0x2c   :  { %161 = vperm.xlu1 %2189, %v144_v3   ;;  %1947 = vmatprep.subr.bf16.mxu1 %v3014_v13  ;;  %v2506_v34 = vld [vmem:[#allocation2 + $0x30] ss:$12 sps:$4 sm:$0xff]   ;;  %v2510_v36 = vld [vmem:[#allocation2 + $0x4c] ss:$12 sps:$4 sm:$0xff]   ;;  %v2207_v39 = vld [vmem:[#allocation4 + $0x8] sm:$0xff]  }
  0x2d   :  { %155 = vperm.xlu0 %2188, %v142_v4   ;;  %v2519_v42 = vld [vmem:[#allocation2 + $0x48] ss:$12 sps:$4 sm:$0xff]   ;;  %v2529_v46 = vld [vmem:[#allocation2 + $0x60] ss:$12 sps:$4 sm:$0xff]   ;;  %v2539_v49 = vld [vmem:[#allocation2 + $0x78] ss:$12 sps:$4 sm:$0xff]  }
  0x2e   :  { %v2533_v47 = vld [vmem:[#allocation2 + $0x7c] ss:$12 sps:$4 sm:$0xff]   ;;  %v2542_v50 = vld [vmem:[#allocation2 + $0x94] ss:$12 sps:$4 sm:$0xff]   ;;  %v2552_v54 = vld [vmem:[#allocation2 + $0xac] ss:$12 sps:$4 sm:$0xff]  }
  0x2f   :  { %v2544_v52 = vld [vmem:[#allocation2 + $0x20] ss:$12 sps:$4 sm:$0xff]   ;;  %v2548_v53 = vld [vmem:[#allocation2 + $0x90] ss:$12 sps:$4 sm:$0xff]   ;;  %v2555_v55 = vld [vmem:[#allocation2 + $0x38] ss:$12 sps:$4 sm:$0xff]  }
  0x30   :  { %167 = vperm.xlu1 %2189, %v146_v6   ;;  %v2561_v56 = vld [vmem:[#allocation2 + $0xa8] ss:$12 sps:$4 sm:$0xff]   ;;  %v2564_v57 = vld [vmem:[#allocation2 + $0xc4] ss:$12 sps:$4 sm:$0xff]   ;;  %v2572_v59 = vld [vmem:[#allocation2 + $0xc0] ss:$12 sps:$4 sm:$0xff]  }
  0x31   :  { %164 = vperm.xlu0 %2188, %v145_v7   ;;  %v2567_v58 = vld [vmem:[#allocation2 + $0x50] ss:$12 sps:$4 sm:$0xff]   ;;  %v2577_v60 = vld [vmem:[#allocation2 + $0x68] ss:$12 sps:$4 sm:$0xff]   ;;  %v2583_v61 = vld [vmem:[#allocation2 + $0x80] ss:$12 sps:$4 sm:$0xff]  }
  0x32   :  { %v2591_v62 = vld [vmem:[#allocation2 + $0x98] ss:$12 sps:$4 sm:$0xff]   ;;  %v2597_v63 = vld [vmem:[#allocation2 + $0xb0] ss:$12 sps:$4 sm:$0xff]   ;;  %v2603_v1 = vld [vmem:[#allocation2 + $0xc8] ss:$12 sps:$4 sm:$0xff]  }
  0x34   :  { %173 = vperm.xlu1 %2189, %v148_v11  }
  0x35   :  { %170 = vperm.xlu0 %2188, %v147_v12  }
  0x39   :  { %364 = vperm.xlu0 %2188, %v362_v14  }
  0xa7   :  { %v159_v17 = vpop.permute.xlu1 %158 }
  0xa8   :  { %v153_v18 = vpop.permute.xlu0 %152  ;;  %vm177_vm0 = vcmp.eq.s32.totalorder %v159_v17, %v2484_v16 }
  0xa9   :  { %vm175_vm1 = vcmp.eq.s32.totalorder %v153_v18, %v2484_v16  ;;  %v185_v19 = vsel %vm177_vm0, 1.0, %v3014_v13 }
  0xaa   :  { %v183_v22 = vsel %vm175_vm1, 1.0, %v3014_v13 }
  0xab   :  { %v162_v20 = vpop.permute.xlu1 %161 }
  0xac   :  { %v156_v21 = vpop.permute.xlu0 %155  ;;  %vm178_vm2 = vcmp.eq.s32.totalorder %v162_v20, %v2484_v16 }
  0xad   :  { %vm176_vm3 = vcmp.eq.s32.totalorder %v156_v21, %v2484_v16  ;;  %v186_v23 = vsel %vm178_vm2, 1.0, %v3014_v13 }
  0xae   :  { %v184_v24 = vsel %vm176_vm3, 1.0, %v3014_v13  ;;  %v192_v26 = vpack.c.bf16 %v186_v23, %v185_v19 }
  0xaf   :  { %v191_v27 = vpack.c.bf16 %v184_v24, %v183_v22  ;;  %v168_v29 = vpop.permute.xlu1 %167 }
  0xb0   :  { %v165_v30 = vpop.permute.xlu0 %164  ;;  %vm180_vm5 = vcmp.eq.s32.totalorder %v168_v29, %v2484_v16 }
  0xb1   :  { %vm179_vm6 = vcmp.eq.s32.totalorder %v165_v30, %v2484_v16  ;;  %1748 = vmatmul.mubr.msk.bf16.vlgmr.msra.gmra.mrb[0].mxu0 %vm211_vm4, %v191_v27  ;;  %1939 = vmatprep.mubr.msk.bf16.mxu1 %vm211_vm4, %v191_v27  ;;  %v188_v32 = vsel %vm180_vm5, 1.0, %v3014_v13 }
  0xb2   :  { %v187_v33 = vsel %vm179_vm6, 1.0, %v3014_v13  ;;  %554 = vmatpush1.bf16.msra.mxu0 %v2494_v25  ;;  %1940 = vmatmul.mubr.msk.bf16.vlgmr.msra.gmra.mrb[0].mxu1 %vm211_vm4, %v192_v26 }
  0xb3   :  { %v193_v35 = vpack.c.bf16 %v188_v32, %v187_v33  ;;  %555 = vmatprep.subr.bf16.mxu0 %v2496_v28  ;;  %266 = vmatprep.mubr.bf16.mxu0 %v3012_v0  ;;  %v174_v37 = vpop.permute.xlu1 %173 }
  0xb4   :  { %v171_v38 = vpop.permute.xlu0 %170  ;;  %1948 = vmatpush3.bf16.msra.mxu1 %v2203_v31  ;;  %vm182_vm7 = vcmp.eq.s32.totalorder %v174_v37, %v2484_v16 }
  0xb5   :  { %vm181_vm8 = vcmp.eq.s32.totalorder %v171_v38, %v2484_v16  ;;  %1943 = vmatprep.mubr.msk.bf16.mxu1 %vm211_vm4, %v193_v35  ;;  %1949 = vmatprep.subr.bf16.mxu1 %v3014_v13  ;;  %v190_v40 = vsel %vm182_vm7, 1.0, %v3014_v13 }
  0xb6   :  { %v189_v41 = vsel %vm181_vm8, 1.0, %v3014_v13  ;;  %556 = vmatpush1.bf16.msra.mxu0 %v2506_v34 }
  0xb7   :  { %v194_v43 = vpack.c.bf16 %v190_v40, %v189_v41  ;;  %557 = vmatprep.subr.bf16.mxu0 %v2510_v36 }
  0xb8   :  { %v365_v45 = vpop.permute.xlu0 %364  ;;  %1950 = vmatpush3.bf16.msra.mxu1 %v2207_v39 }
  0xb9   :  { %1749 = vmatmul.mubr.msk.bf16.gmra.mrb[4].mxu0 %vm211_vm4, %v192_v26  ;;  %1955 = vmatprep.subr.bf16.mxu1 %v3014_v13  ;;  %vm366_vm9 = vcmp.eq.s32.totalorder %v365_v45, %v2484_v16 }
  0xba   :  { %558 = vmatpush1.bf16.msra.mxu0 %v2519_v42  ;;  %1944 = vmatmul.mubr.msk.bf16.gmra.mrb[4].mxu1 %vm211_vm4, %v194_v43  ;;  %v367_v48 = vsel %vm366_vm9, 1.0, %v3014_v13 }
  0xbb   :  { %559 = vmatprep.subr.bf16.mxu0 %v2522_v44  ;;  %276 = vmatprep.mubr.bf16.mxu0 %v3012_v0  ;;  %v368_v51 = vpack.c.bf16 %v367_v48, %v367_v48 }
  0xbc   :  { %1951 = vmatprep.mubr.msk.bf16.mxu1 %vm2399_vm10, %v3014_v13 }
  0xbe   :  { %560 = vmatpush1.bf16.msra.mxu0 %v2529_v46 }
  0xbf   :  { %561 = vmatprep.subr.bf16.mxu0 %v2533_v47 }
  0xc1   :  { %1750 = vmatmul.mubr.msk.bf16.gmra.mrb[8].mxu0 %vm211_vm4, %v193_v35 }
  0xc2   :  { %562 = vmatpush1.bf16.msra.mxu0 %v2539_v49  ;;  %1952 = vmatmul.mubr.msk.bf16.vlgmr.msra.gmra.mrb[8].mxu1 %vm381_vm11, %v368_v51 }
  0xc3   :  { %563 = vmatprep.subr.bf16.mxu0 %v2542_v50  ;;  %286 = vmatprep.mubr.bf16.mxu0 %v3012_v0 }
  0xc4   :  { %1956 = vmatpush3.bf16.msra.mxu1 %v2544_v52  ;;  %1971 = vmatprep.mubr.msk.bf16.mxu1 %vm2399_vm10, %v3014_v13 }
  0xc5   :  { %1957 = vmatprep.subr.bf16.mxu1 %v3014_v13 }
  0xc6   :  { %564 = vmatpush1.bf16.msra.mxu0 %v2548_v53 }
  0xc7   :  { %565 = vmatprep.subr.bf16.mxu0 %v2552_v54 }
  0xc8   :  { %1958 = vmatpush3.bf16.msra.mxu1 %v2555_v55 }
  0xc9   :  { %1751 = vmatmul.mubr.msk.bf16.gmra.mrb[12].mxu0 %vm211_vm4, %v194_v43  ;;  %1959 = vmatprep.subr.bf16.mxu1 %v3014_v13 }
  0xca   :  { %566 = vmatpush1.bf16.msra.mxu0 %v2561_v56  ;;  %585 = vmatprep.mubr.bf16.mxu0 %v3012_v0 }
  0xcb   :  { %567 = vmatprep.subr.bf16.mxu0 %v2564_v57 }
  0xcc   :  { %1960 = vmatpush3.bf16.msra.mxu1 %v2567_v58 }
  0xcd   :  { %1961 = vmatprep.subr.bf16.mxu1 %v3014_v13 }
  0xce   :  { %568 = vmatpush1.bf16.msra.mxu0 %v2572_v59 }
  0xcf   :  { %661 = vmatprep.subr.bf16.mxu0 %v2470_v10 }
  0xd0   :  { %1962 = vmatpush3.bf16.msra.mxu1 %v2577_v60 }
  0xd1   :  { %586 = vmatmul.mubr.bf16.vlgmr.msra.gmra.mrb[16].mxu0 %v3012_v0  ;;  %1963 = vmatprep.subr.bf16.mxu1 %v3014_v13 }
  0xd2   :  { %662 = vmatpush1.bf16.msra.mxu0 %v2494_v25  ;;  %693 = vmatprep.mubr.bf16.mxu0 %v3012_v0 }
  0xd3   :  { %663 = vmatprep.subr.bf16.mxu0 %v2496_v28 }
  0xd4   :  { %1964 = vmatpush3.bf16.msra.mxu1 %v2583_v61 }
  0xd5   :  { %1965 = vmatprep.subr.bf16.mxu1 %v3014_v13 }
  0xd6   :  { %664 = vmatpush1.bf16.msra.mxu0 %v2506_v34 }
  0xd7   :  { %665 = vmatprep.subr.bf16.mxu0 %v2510_v36 }
  0xd8   :  { %1966 = vmatpush3.bf16.msra.mxu1 %v2591_v62 }
  0xd9   :  { %1967 = vmatprep.subr.bf16.mxu1 %v3014_v13 }
  0xda   :  { %666 = vmatpush1.bf16.msra.mxu0 %v2519_v42 }
  0xdb   :  { %667 = vmatprep.subr.bf16.mxu0 %v2522_v44 }
  0xdc   :  { %1968 = vmatpush3.bf16.msra.mxu1 %v2597_v63 }
  0xdd   :  { %1969 = vmatprep.subr.bf16.mxu1 %v3014_v13 }
  0xde   :  { %668 = vmatpush1.bf16.msra.mxu0 %v2529_v46 }
  0xdf   :  { %669 = vmatprep.subr.bf16.mxu0 %v2533_v47 }
  0xe0   :  { %1970 = vmatpush3.bf16.msra.mxu1 %v2603_v1 }
  0xe1   :  { %1975 = vmatprep.subr.bf16.mxu1 %v3014_v13 }
  0xe2   :  { %670 = vmatpush1.bf16.msra.mxu0 %v2539_v49 }
  0xe3   :  { %1972 = vmatmul.mubr.bf16.vlgmr.msra.gmra.mrb[12].mxu1 %v3012_v0  ;;  %671 = vmatprep.subr.bf16.mxu0 %v2542_v50 }
  0xe4   :  { %1976 = vmatpush3.bf16.msra.mxu1 %v2544_v52  ;;  %1991 = vmatprep.mubr.msk.bf16.mxu1 %vm2399_vm10, %v3014_v13 }
  0xe5   :  { %1977 = vmatprep.subr.bf16.mxu1 %v3014_v13 }
  0xe6   :  { %672 = vmatpush1.bf16.msra.mxu0 %v2548_v53 }
  0xe7   :  { %673 = vmatprep.subr.bf16.mxu0 %v2552_v54 }
  0xe8   :  { %1978 = vmatpush3.bf16.msra.mxu1 %v2555_v55 }
  0xe9   :  { %1979 = vmatprep.subr.bf16.mxu1 %v3014_v13 }
  0xea   :  { %674 = vmatpush1.bf16.msra.mxu0 %v2561_v56 }
  0xeb   :  { %675 = vmatprep.subr.bf16.mxu0 %v2564_v57 }
  0xec   :  { %1980 = vmatpush3.bf16.msra.mxu1 %v2567_v58 }
  0xed   :  { %1981 = vmatprep.subr.bf16.mxu1 %v3014_v13 }
  0xee   :  { %676 = vmatpush1.bf16.msra.mxu0 %v2572_v59 }
  0xef   :  { %766 = vmatprep.subr.bf16.mxu0 %v2470_v10 }
  0xf0   :  { %1982 = vmatpush3.bf16.msra.mxu1 %v2577_v60 }
  0xf1   :  { %1983 = vmatprep.subr.bf16.mxu1 %v3014_v13 }
  0xf4   :  { %1984 = vmatpush3.bf16.msra.mxu1 %v2583_v61 }
  0xf5   :  { %1985 = vmatprep.subr.bf16.mxu1 %v3014_v13 }
  0xf8   :  { %1986 = vmatpush3.bf16.msra.mxu1 %v2591_v62 }
  0xf9   :  { %1987 = vmatprep.subr.bf16.mxu1 %v3014_v13 }
  0xfc   :  { %1988 = vmatpush3.bf16.msra.mxu1 %v2597_v63 }
  0xfd   :  { %1989 = vmatprep.subr.bf16.mxu1 %v3014_v13 }
 0x100   :  { %1990 = vmatpush3.bf16.msra.mxu1 %v2603_v1 }
 0x101   :  { %1995 = vmatprep.subr.bf16.mxu1 %v3014_v13 }
 0x184   :  { %v258_v2 = vpop.f32.mrb[0].mxu0 }
 0x185   :  { %v260_v3 = vpop.f32.mrb[1].mxu0  ;;  %v2637_v4 = vpop.f32.mrb[0].mxu1 }
 0x186   :  { %v2639_v5 = vpop.f32.mrb[2].mxu0  ;;  %v331_v6 = vpop.f32.mrb[1].mxu1 }
 0x187   :  { %v2641_v7 = vpop.f32.mrb[3].mxu0  ;;  %v2643_v8 = vpop.f32.mrb[2].mxu1 }
 0x188   :  { %v2645_v9 = vpop.f32.mrb[3].mxu1 }
 0x18c   :  { %v2647_v11 = vpop.f32.mrb[4].mxu0 }
 0x18d   :  { %v2649_v12 = vpop.f32.mrb[5].mxu0  ;;  %v2651_v14 = vpop.f32.mrb[4].mxu1 }
 0x18e   :  { %v2653_v16 = vpop.f32.mrb[6].mxu0  ;;  %v2655_v17 = vpop.f32.mrb[5].mxu1 }
 0x18f   :  { %v2657_v18 = vpop.f32.mrb[7].mxu0  ;;  %v2659_v19 = vpop.f32.mrb[6].mxu1 }
 0x190   :  { %v2661_v20 = vpop.f32.mrb[7].mxu1 }
 0x194   :  { %v2663_v21 = vpop.f32.mrb[8].mxu0 }
 0x195   :  { %v2665_v22 = vpop.f32.mrb[9].mxu0 }
 0x196   :  { %v2667_v23 = vpop.f32.mrb[10].mxu0 }
 0x197   :  { %v2669_v24 = vpop.f32.mrb[11].mxu0 }
 0x19c   :  { %v2671_v26 = vpop.f32.mrb[12].mxu0 }
 0x19d   :  { %v2673_v27 = vpop.f32.mrb[13].mxu0 }
 0x19e   :  { %v2675_v29 = vpop.f32.mrb[14].mxu0 }
 0x19f   :  { %v2677_v30 = vpop.f32.mrb[15].mxu0 }
 0x1a4   :  { %v587_v31 = vpop.f32.mrb[16].mxu0 }
 0x1a5   :  { %v634_v32 = vadd.f32 %v587_v31, %v258_v2  ;;  %v589_v33 = vpop.f32.mrb[17].mxu0  ;;  %v2682_v2 = vld [vmem:[%s3009_s3] ss:$0 sm:$0xff] }
 0x1a6   :  { %v641_v35 = vadd.f32 %v589_v33, %v260_v3  ;;  %v591_v37 = vpop.f32.mrb[18].mxu0 }
 0x1a7   :  { %v1783_v38 = vmul.f32 -1.442695, %v634_v32  ;;  %v592_v39 = vpop.f32.mrb[19].mxu0 }
 0x1a8   :  { %v1784_v40 = vmul.f32 -1.442695, %v641_v35 }
 0x1a9   :  { %2252 = vpow2.f32 %v1783_v38 }
 0x1aa   :  { %2254 = vpow2.f32 %v1784_v40 }
 0x1b3   :  { %v2253_v41 = vpop.eup %2252 }
 0x1b4   :  { %v638_v43 = vadd.f32 1.0, %v2253_v41  ;;  %v2255_v0 = vpop.eup %2254 }
 0x1b5   :  { %v645_v3 = vadd.f32 1.0, %v2255_v0  ;;  %v3016_v0 = vmov 0  }
 0x1b6   :  { %2256 = vrcp.f32 %v638_v43  ;;  %v628_v45 = vpop.f32.mrb[12].mxu1 }
 0x1b7   :  { %v1973_v48 = vpop.f32.mrb[13].mxu1  ;;  %v652_v31 = vadd.f32 %v2682_v2, %v628_v45  ;;  %2258 = vrcp.f32 %v645_v3 }
 0x1b8   :  { %v631_v51 = vpop.f32.mrb[14].mxu1 }
 0x1b9   :  { %v1974_v15 = vpop.f32.mrb[15].mxu1 }
 0x1c0   :  { %v2257_v32 = vpop.eup %2256 }
 0x1c1   :  { %v653_v33 = vmul.f32 %v2257_v32, %v652_v31  ;;  %v2259_v37 = vpop.eup %2258 }
 0x1c2   :  { %v656_v38 = vsub.f32 1.0, %v2259_v37  ;;  %v658_v41 = vmul.f32 0.0, %v2259_v37 }
 0x1c3   :  { %v654_v35 = vadd.f32 %v653_v33, %v331_v6 }
 0x1c5   :  { %2260 = vtanh.f32 %v654_v35 }
 0x1cf   :  { %v2261_v39 = vpop.eup %2260 }
 0x1d0   :  { %v657_v40 = vmul.f32 %v2261_v39, %v656_v38 }
 0x1d2   :  { %v659_v15 = vadd.f32 %v658_v41, %v657_v40 }
 0x1d4   :  { %v2685_v43 = vpack.c.bf16 %v659_v15, %v659_v15 }
 0x1d6   :  { %694 = vmatmul.mubr.bf16.vlgmr.msra.gmra.mrb[20].mxu0 %v2685_v43  ;;  %1992 = vmatmul.mubr.bf16.vlgmr.msra.gmra.mrb[16].mxu1 %v2685_v43 }
 0x1d7   :  { %767 = vmatpush1.bf16.msra.mxu0 %v2494_v25  ;;  %1996 = vmatpush3.bf16.msra.mxu1 %v2544_v52 }
 0x1d8   :  { %768 = vmatprep.subr.bf16.mxu0 %v2496_v28  ;;  %1997 = vmatprep.subr.bf16.mxu1 %v3014_v13 }
 0x1d9   :  { %798 = vmatprep.mubr.bf16.mxu0 %v3016_v0  ;;  %2011 = vmatprep.mubr.msk.bf16.mxu1 %vm2399_vm10, %v3014_v13 }
 0x1db   :  { %769 = vmatpush1.bf16.msra.mxu0 %v2506_v34  ;;  %1998 = vmatpush3.bf16.msra.mxu1 %v2555_v55 }
 0x1dc   :  { %770 = vmatprep.subr.bf16.mxu0 %v2510_v36  ;;  %1999 = vmatprep.subr.bf16.mxu1 %v3014_v13 }
 0x1df   :  { %771 = vmatpush1.bf16.msra.mxu0 %v2519_v42  ;;  %2000 = vmatpush3.bf16.msra.mxu1 %v2567_v58 }
 0x1e0   :  { %772 = vmatprep.subr.bf16.mxu0 %v2522_v44  ;;  %2001 = vmatprep.subr.bf16.mxu1 %v3014_v13 }
 0x1e3   :  { %773 = vmatpush1.bf16.msra.mxu0 %v2529_v46  ;;  %2002 = vmatpush3.bf16.msra.mxu1 %v2577_v60 }
 0x1e4   :  { %774 = vmatprep.subr.bf16.mxu0 %v2533_v47  ;;  %2003 = vmatprep.subr.bf16.mxu1 %v3014_v13 }
 0x1e7   :  { %775 = vmatpush1.bf16.msra.mxu0 %v2539_v49  ;;  %2004 = vmatpush3.bf16.msra.mxu1 %v2583_v61 }
 0x1e8   :  { %776 = vmatprep.subr.bf16.mxu0 %v2542_v50  ;;  %2005 = vmatprep.subr.bf16.mxu1 %v3014_v13 }
 0x1eb   :  { %777 = vmatpush1.bf16.msra.mxu0 %v2548_v53  ;;  %2006 = vmatpush3.bf16.msra.mxu1 %v2591_v62 }
 0x1ec   :  { %778 = vmatprep.subr.bf16.mxu0 %v2552_v54  ;;  %2007 = vmatprep.subr.bf16.mxu1 %v3014_v13 }
 0x1ef   :  { %779 = vmatpush1.bf16.msra.mxu0 %v2561_v56  ;;  %2008 = vmatpush3.bf16.msra.mxu1 %v2597_v63 }
 0x1f0   :  { %780 = vmatprep.subr.bf16.mxu0 %v2564_v57  ;;  %2009 = vmatprep.subr.bf16.mxu1 %v3014_v13 }
 0x1f3   :  { %781 = vmatpush1.bf16.msra.mxu0 %v2572_v59  ;;  %2010 = vmatpush3.bf16.msra.mxu1 %v2603_v1 }
 0x1f4   :  { %871 = vmatprep.subr.bf16.mxu0 %v2470_v10  ;;  %2015 = vmatprep.subr.bf16.mxu1 %v3014_v13 }
 0x2a9   :  { %v695_v6 = vpop.f32.mrb[20].mxu0  ;;  %v736_v45 = vpop.f32.mrb[16].mxu1 }
 0x2aa   :  { %v742_v48 = vadd.f32 %v695_v6, %v2639_v5  ;;  %v697_v51 = vpop.f32.mrb[21].mxu0  ;;  %v1993_v3 = vpop.f32.mrb[17].mxu1  ;;  %v756_v5 = vadd.f32 %v2682_v2, %v736_v45 }
 0x2ab   :  { %v749_v31 = vadd.f32 %v697_v51, %v2641_v7  ;;  %v699_v32 = vpop.f32.mrb[22].mxu0  ;;  %v739_v33 = vpop.f32.mrb[18].mxu1  ;;  %v762_v3 = vunpack.c.l.bf16 %v2685_v43 }
 0x2ac   :  { %v1786_v35 = vmul.f32 -1.442695, %v742_v48  ;;  %v700_v37 = vpop.f32.mrb[23].mxu0  ;;  %v1994_v38 = vpop.f32.mrb[19].mxu1 }
 0x2ad   :  { %v1787_v39 = vmul.f32 -1.442695, %v749_v31 }
 0x2ae   :  { %2262 = vpow2.f32 %v1786_v35 }
 0x2af   :  { %2264 = vpow2.f32 %v1787_v39 }
 0x2b8   :  { %v2263_v40 = vpop.eup %2262 }
 0x2b9   :  { %v2265_v41 = vpop.eup %2264  ;;  %v746_v15 = vadd.f32 1.0, %v2263_v40 }
 0x2ba   :  { %v753_v13 = vadd.f32 1.0, %v2265_v41 }
 0x2bb   :  { %2266 = vrcp.f32 %v746_v15 }
 0x2bc   :  { %2268 = vrcp.f32 %v753_v13  ;;  %v3017_v13 = vmov 0.0  }
 0x2c5   :  { %v2267_v6 = vpop.eup %2266 }
 0x2c6   :  { %v2269_v7 = vpop.eup %2268  ;;  %v757_v51 = vmul.f32 %v2267_v6, %v756_v5 }
 0x2c7   :  { %v763_v32 = vmul.f32 %v2269_v7, %v762_v3  ;;  %v760_v31 = vsub.f32 1.0, %v2269_v7 }
 0x2c8   :  { %v758_v48 = vadd.f32 %v757_v51, %v2645_v9 }
 0x2ca   :  { %2270 = vtanh.f32 %v758_v48 }
 0x2d4   :  { %v2271_v33 = vpop.eup %2270 }
 0x2d5   :  { %v761_v35 = vmul.f32 %v2271_v33, %v760_v31 }
 0x2d7   :  { %v764_v37 = vadd.f32 %v763_v32, %v761_v35 }
 0x2d9   :  { %v2729_v38 = vpack.c.bf16 %v764_v37, %v764_v37 }
 0x2db   :  { %799 = vmatmul.mubr.bf16.vlgmr.msra.gmra.mrb[24].mxu0 %v2729_v38  ;;  %2012 = vmatmul.mubr.bf16.vlgmr.msra.gmra.mrb[20].mxu1 %v2729_v38  ;;  %v867_v37 = vunpack.c.l.bf16 %v2729_v38 }
 0x2dc   :  { %872 = vmatpush1.bf16.msra.mxu0 %v2494_v25  ;;  %2016 = vmatpush3.bf16.msra.mxu1 %v2544_v52 }
 0x2dd   :  { %873 = vmatprep.subr.bf16.mxu0 %v2496_v28  ;;  %2017 = vmatprep.subr.bf16.mxu1 %v3017_v13 }
 0x2de   :  { %903 = vmatprep.mubr.bf16.mxu0 %v3016_v0  ;;  %2031 = vmatprep.mubr.msk.bf16.mxu1 %vm2399_vm10, %v3017_v13 }
 0x2e0   :  { %874 = vmatpush1.bf16.msra.mxu0 %v2506_v34  ;;  %2018 = vmatpush3.bf16.msra.mxu1 %v2555_v55 }
 0x2e1   :  { %875 = vmatprep.subr.bf16.mxu0 %v2510_v36  ;;  %2019 = vmatprep.subr.bf16.mxu1 %v3017_v13 }
 0x2e4   :  { %876 = vmatpush1.bf16.msra.mxu0 %v2519_v42  ;;  %2020 = vmatpush3.bf16.msra.mxu1 %v2567_v58 }
 0x2e5   :  { %877 = vmatprep.subr.bf16.mxu0 %v2522_v44  ;;  %2021 = vmatprep.subr.bf16.mxu1 %v3017_v13 }
 0x2e8   :  { %878 = vmatpush1.bf16.msra.mxu0 %v2529_v46  ;;  %2022 = vmatpush3.bf16.msra.mxu1 %v2577_v60 }
 0x2e9   :  { %879 = vmatprep.subr.bf16.mxu0 %v2533_v47  ;;  %2023 = vmatprep.subr.bf16.mxu1 %v3017_v13 }
 0x2ec   :  { %880 = vmatpush1.bf16.msra.mxu0 %v2539_v49  ;;  %2024 = vmatpush3.bf16.msra.mxu1 %v2583_v61 }
 0x2ed   :  { %881 = vmatprep.subr.bf16.mxu0 %v2542_v50  ;;  %2025 = vmatprep.subr.bf16.mxu1 %v3017_v13 }
 0x2f0   :  { %882 = vmatpush1.bf16.msra.mxu0 %v2548_v53  ;;  %2026 = vmatpush3.bf16.msra.mxu1 %v2591_v62 }
 0x2f1   :  { %883 = vmatprep.subr.bf16.mxu0 %v2552_v54  ;;  %2027 = vmatprep.subr.bf16.mxu1 %v3017_v13 }
 0x2f4   :  { %884 = vmatpush1.bf16.msra.mxu0 %v2561_v56  ;;  %2028 = vmatpush3.bf16.msra.mxu1 %v2597_v63 }
 0x2f5   :  { %885 = vmatprep.subr.bf16.mxu0 %v2564_v57  ;;  %2029 = vmatprep.subr.bf16.mxu1 %v3017_v13 }
 0x2f8   :  { %886 = vmatpush1.bf16.msra.mxu0 %v2572_v59  ;;  %2030 = vmatpush3.bf16.msra.mxu1 %v2603_v1 }
 0x2f9   :  { %976 = vmatprep.subr.bf16.mxu0 %v2470_v10  ;;  %2035 = vmatprep.subr.bf16.mxu1 %v3017_v13 }
 0x3ae   :  { %v800_v9 = vpop.f32.mrb[24].mxu0  ;;  %v841_v43 = vpop.f32.mrb[20].mxu1 }
 0x3af   :  { %v847_v45 = vadd.f32 %v800_v9, %v2647_v11  ;;  %v802_v39 = vpop.f32.mrb[25].mxu0  ;;  %v2013_v40 = vpop.f32.mrb[21].mxu1  ;;  %v861_v11 = vadd.f32 %v2682_v2, %v841_v43 }
 0x3b0   :  { %v854_v41 = vadd.f32 %v802_v39, %v2649_v12  ;;  %v804_v15 = vpop.f32.mrb[26].mxu0  ;;  %v844_v5 = vpop.f32.mrb[22].mxu1 }
 0x3b1   :  { %v1788_v6 = vmul.f32 -1.442695, %v847_v45  ;;  %v805_v3 = vpop.f32.mrb[27].mxu0  ;;  %v2014_v7 = vpop.f32.mrb[23].mxu1 }
 0x3b2   :  { %v1789_v51 = vmul.f32 -1.442695, %v854_v41 }
 0x3b3   :  { %2272 = vpow2.f32 %v1788_v6 }
 0x3b4   :  { %2274 = vpow2.f32 %v1789_v51 }
 0x3bd   :  { %v2273_v32 = vpop.eup %2272 }
 0x3be   :  { %v2275_v48 = vpop.eup %2274  ;;  %v851_v31 = vadd.f32 1.0, %v2273_v32 }
 0x3bf   :  { %v858_v33 = vadd.f32 1.0, %v2275_v48 }
 0x3c0   :  { %2276 = vrcp.f32 %v851_v31 }
 0x3c1   :  { %2278 = vrcp.f32 %v858_v33 }
 0x3ca   :  { %v2277_v35 = vpop.eup %2276 }
 0x3cb   :  { %v2279_v12 = vpop.eup %2278  ;;  %v862_v9 = vmul.f32 %v2277_v35, %v861_v11 }
 0x3cc   :  { %v868_v39 = vmul.f32 %v2279_v12, %v867_v37  ;;  %v865_v40 = vsub.f32 1.0, %v2279_v12 }
 0x3cd   :  { %v863_v45 = vadd.f32 %v2637_v4, %v862_v9 }
 0x3cf   :  { %2280 = vtanh.f32 %v863_v45 }
 0x3d9   :  { %v2281_v41 = vpop.eup %2280 }
 0x3da   :  { %v866_v15 = vmul.f32 %v2281_v41, %v865_v40 }
 0x3dc   :  { %v869_v5 = vadd.f32 %v868_v39, %v866_v15 }
 0x3de   :  { %v2773_v6 = vpack.c.bf16 %v869_v5, %v869_v5 }
 0x3e0   :  { %904 = vmatmul.mubr.bf16.vlgmr.msra.gmra.mrb[28].mxu0 %v2773_v6  ;;  %2032 = vmatmul.mubr.bf16.vlgmr.msra.gmra.mrb[24].mxu1 %v2773_v6  ;;  %v972_v45 = vunpack.c.l.bf16 %v2773_v6 }
 0x3e1   :  { %977 = vmatpush1.bf16.msra.mxu0 %v2494_v25  ;;  %2036 = vmatpush3.bf16.msra.mxu1 %v2544_v52 }
 0x3e2   :  { %978 = vmatprep.subr.bf16.mxu0 %v2496_v28  ;;  %2037 = vmatprep.subr.bf16.mxu1 %v3017_v13 }
 0x3e3   :  { %1008 = vmatprep.mubr.bf16.mxu0 %v3016_v0  ;;  %2051 = vmatprep.mubr.msk.bf16.mxu1 %vm2399_vm10, %v3017_v13 }
 0x3e5   :  { %979 = vmatpush1.bf16.msra.mxu0 %v2506_v34  ;;  %2038 = vmatpush3.bf16.msra.mxu1 %v2555_v55 }
 0x3e6   :  { %980 = vmatprep.subr.bf16.mxu0 %v2510_v36  ;;  %2039 = vmatprep.subr.bf16.mxu1 %v3017_v13 }
 0x3e9   :  { %981 = vmatpush1.bf16.msra.mxu0 %v2519_v42  ;;  %2040 = vmatpush3.bf16.msra.mxu1 %v2567_v58 }
 0x3ea   :  { %982 = vmatprep.subr.bf16.mxu0 %v2522_v44  ;;  %2041 = vmatprep.subr.bf16.mxu1 %v3017_v13 }
 0x3ed   :  { %983 = vmatpush1.bf16.msra.mxu0 %v2529_v46  ;;  %2042 = vmatpush3.bf16.msra.mxu1 %v2577_v60 }
 0x3ee   :  { %984 = vmatprep.subr.bf16.mxu0 %v2533_v47  ;;  %2043 = vmatprep.subr.bf16.mxu1 %v3017_v13 }
 0x3f1   :  { %985 = vmatpush1.bf16.msra.mxu0 %v2539_v49  ;;  %2044 = vmatpush3.bf16.msra.mxu1 %v2583_v61 }
 0x3f2   :  { %986 = vmatprep.subr.bf16.mxu0 %v2542_v50  ;;  %2045 = vmatprep.subr.bf16.mxu1 %v3017_v13 }
 0x3f5   :  { %987 = vmatpush1.bf16.msra.mxu0 %v2548_v53  ;;  %2046 = vmatpush3.bf16.msra.mxu1 %v2591_v62 }
 0x3f6   :  { %988 = vmatprep.subr.bf16.mxu0 %v2552_v54  ;;  %2047 = vmatprep.subr.bf16.mxu1 %v3017_v13 }
 0x3f9   :  { %989 = vmatpush1.bf16.msra.mxu0 %v2561_v56  ;;  %2048 = vmatpush3.bf16.msra.mxu1 %v2597_v63 }
 0x3fa   :  { %990 = vmatprep.subr.bf16.mxu0 %v2564_v57  ;;  %2049 = vmatprep.subr.bf16.mxu1 %v3017_v13 }
 0x3fd   :  { %991 = vmatpush1.bf16.msra.mxu0 %v2572_v59  ;;  %2050 = vmatpush3.bf16.msra.mxu1 %v2603_v1 }
 0x3fe   :  { %1081 = vmatprep.subr.bf16.mxu0 %v2470_v10  ;;  %2055 = vmatprep.subr.bf16.mxu1 %v3017_v13 }
 0x4b3   :  { %v905_v4 = vpop.f32.mrb[28].mxu0  ;;  %v946_v38 = vpop.f32.mrb[24].mxu1 }
 0x4b4   :  { %v952_v43 = vadd.f32 %v905_v4, %v2653_v16  ;;  %v907_v3 = vpop.f32.mrb[29].mxu0  ;;  %v2033_v7 = vpop.f32.mrb[25].mxu1  ;;  %v966_v16 = vadd.f32 %v2682_v2, %v946_v38 }
 0x4b5   :  { %v959_v51 = vadd.f32 %v907_v3, %v2657_v18  ;;  %v909_v32 = vpop.f32.mrb[30].mxu0  ;;  %v949_v48 = vpop.f32.mrb[26].mxu1 }
 0x4b6   :  { %v1790_v31 = vmul.f32 -1.442695, %v952_v43  ;;  %v910_v33 = vpop.f32.mrb[31].mxu0  ;;  %v2034_v11 = vpop.f32.mrb[27].mxu1 }
 0x4b7   :  { %v1791_v35 = vmul.f32 -1.442695, %v959_v51 }
 0x4b8   :  { %2282 = vpow2.f32 %v1790_v31 }
 0x4b9   :  { %2284 = vpow2.f32 %v1791_v35 }
 0x4c2   :  { %v2283_v37 = vpop.eup %2282 }
 0x4c3   :  { %v2285_v10 = vpop.eup %2284  ;;  %v956_v12 = vadd.f32 1.0, %v2283_v37 }
 0x4c4   :  { %v963_v9 = vadd.f32 1.0, %v2285_v10 }
 0x4c5   :  { %2286 = vrcp.f32 %v956_v12 }
 0x4c6   :  { %2288 = vrcp.f32 %v963_v9 }
 0x4cf   :  { %v2287_v39 = vpop.eup %2286 }
 0x4d0   :  { %v2289_v18 = vpop.eup %2288  ;;  %v967_v40 = vmul.f32 %v2287_v39, %v966_v16 }
 0x4d1   :  { %v973_v41 = vmul.f32 %v2289_v18, %v972_v45  ;;  %v970_v5 = vsub.f32 1.0, %v2289_v18 }
 0x4d2   :  { %v968_v15 = vadd.f32 %v2643_v8, %v967_v40  ;;  %v2854_v8 = vld [vmem:[#allocation2 + $0x1c] ss:$12 sps:$4 sm:$0xff]  }
 0x4d4   :  { %2290 = vtanh.f32 %v968_v15 }
 0x4de   :  { %v2291_v4 = vpop.eup %2290 }
 0x4df   :  { %v971_v43 = vmul.f32 %v2291_v4, %v970_v5 }
 0x4e1   :  { %v974_v3 = vadd.f32 %v973_v41, %v971_v43 }
 0x4e3   :  { %v2817_v7 = vpack.c.bf16 %v974_v3, %v974_v3 }
 0x4e5   :  { %1009 = vmatmul.mubr.bf16.vlgmr.msra.gmra.mrb[32].mxu0 %v2817_v7  ;;  %2052 = vmatmul.mubr.bf16.vlgmr.msra.gmra.mrb[28].mxu1 %v2817_v7  ;;  %v1077_v40 = vunpack.c.l.bf16 %v2817_v7 }
 0x4e6   :  { %1082 = vmatpush1.bf16.msra.mxu0 %v2494_v25  ;;  %2056 = vmatpush3.bf16.msra.mxu1 %v2544_v52 }
 0x4e7   :  { %1083 = vmatprep.subr.bf16.mxu0 %v2496_v28  ;;  %2057 = vmatprep.subr.bf16.mxu1 %v3017_v13 }
 0x4e8   :  { %1113 = vmatprep.mubr.bf16.mxu0 %v3016_v0  ;;  %2071 = vmatprep.mubr.msk.bf16.mxu1 %vm2399_vm10, %v3017_v13 }
 0x4ea   :  { %1084 = vmatpush1.bf16.msra.mxu0 %v2506_v34  ;;  %2058 = vmatpush3.bf16.msra.mxu1 %v2555_v55 }
 0x4eb   :  { %1085 = vmatprep.subr.bf16.mxu0 %v2510_v36  ;;  %2059 = vmatprep.subr.bf16.mxu1 %v3017_v13 }
 0x4ee   :  { %1086 = vmatpush1.bf16.msra.mxu0 %v2519_v42  ;;  %2060 = vmatpush3.bf16.msra.mxu1 %v2567_v58 }
 0x4ef   :  { %1087 = vmatprep.subr.bf16.mxu0 %v2522_v44  ;;  %2061 = vmatprep.subr.bf16.mxu1 %v3017_v13 }
 0x4f2   :  { %1088 = vmatpush1.bf16.msra.mxu0 %v2529_v46  ;;  %2062 = vmatpush3.bf16.msra.mxu1 %v2577_v60 }
 0x4f3   :  { %1089 = vmatprep.subr.bf16.mxu0 %v2533_v47  ;;  %2063 = vmatprep.subr.bf16.mxu1 %v3017_v13 }
 0x4f6   :  { %1090 = vmatpush1.bf16.msra.mxu0 %v2539_v49  ;;  %2064 = vmatpush3.bf16.msra.mxu1 %v2583_v61 }
 0x4f7   :  { %1091 = vmatprep.subr.bf16.mxu0 %v2542_v50  ;;  %2065 = vmatprep.subr.bf16.mxu1 %v3017_v13 }
 0x4fa   :  { %1092 = vmatpush1.bf16.msra.mxu0 %v2548_v53  ;;  %2066 = vmatpush3.bf16.msra.mxu1 %v2591_v62 }
 0x4fb   :  { %1093 = vmatprep.subr.bf16.mxu0 %v2552_v54  ;;  %2067 = vmatprep.subr.bf16.mxu1 %v3017_v13 }
 0x4fe   :  { %1094 = vmatpush1.bf16.msra.mxu0 %v2561_v56  ;;  %2068 = vmatpush3.bf16.msra.mxu1 %v2597_v63 }
 0x4ff   :  { %1095 = vmatprep.subr.bf16.mxu0 %v2564_v57  ;;  %2069 = vmatprep.subr.bf16.mxu1 %v3017_v13 }
 0x502   :  { %1096 = vmatpush1.bf16.msra.mxu0 %v2572_v59  ;;  %2070 = vmatpush3.bf16.msra.mxu1 %v2603_v1 }
 0x503   :  { %1186 = vmatprep.subr.bf16.mxu0 %v2854_v8  ;;  %2075 = vmatprep.subr.bf16.mxu1 %v3017_v13 }
 0x5b8   :  { %v1010_v6 = vpop.f32.mrb[32].mxu0  ;;  %v1051_v38 = vpop.f32.mrb[28].mxu1 }
 0x5b9   :  { %v1057_v51 = vadd.f32 %v1010_v6, %v2663_v21  ;;  %v1012_v32 = vpop.f32.mrb[33].mxu0  ;;  %v2053_v48 = vpop.f32.mrb[29].mxu1  ;;  %v1071_v21 = vadd.f32 %v2682_v2, %v1051_v38 }
 0x5ba   :  { %v1064_v31 = vadd.f32 %v1012_v32, %v2665_v22  ;;  %v1014_v33 = vpop.f32.mrb[34].mxu0  ;;  %v1054_v11 = vpop.f32.mrb[30].mxu1 }
 0x5bb   :  { %v1792_v35 = vmul.f32 -1.442695, %v1057_v51  ;;  %v1015_v37 = vpop.f32.mrb[35].mxu0  ;;  %v2054_v10 = vpop.f32.mrb[31].mxu1 }
 0x5bc   :  { %v1793_v12 = vmul.f32 -1.442695, %v1064_v31 }
 0x5bd   :  { %2292 = vpow2.f32 %v1792_v35 }
 0x5be   :  { %2294 = vpow2.f32 %v1793_v12 }
 0x5c7   :  { %v2293_v9 = vpop.eup %2292 }
 0x5c8   :  { %v2295_v16 = vpop.eup %2294  ;;  %v1061_v39 = vadd.f32 1.0, %v2293_v9 }
 0x5c9   :  { %v1068_v45 = vadd.f32 1.0, %v2295_v16 }
 0x5ca   :  { %2296 = vrcp.f32 %v1061_v39 }
 0x5cb   :  { %2298 = vrcp.f32 %v1068_v45 }
 0x5d4   :  { %v2297_v18 = vpop.eup %2296 }
 0x5d5   :  { %v2299_v22 = vpop.eup %2298  ;;  %v1072_v41 = vmul.f32 %v2297_v18, %v1071_v21 }
 0x5d6   :  { %v1078_v15 = vmul.f32 %v2299_v22, %v1077_v40  ;;  %v1075_v4 = vsub.f32 1.0, %v2299_v22  ;;  %v2337_v22 = vld [vmem:[#allocation2 + $0x18] ss:$12 sps:$4 sm:$0xff]  }
 0x5d7   :  { %v1073_v5 = vadd.f32 %v1072_v41, %v2655_v17  ;;  %v2338_v41 = vld [vmem:[#allocation2 + $0x34] ss:$12 sps:$4 sm:$0xff]  }
 0x5d9   :  { %2300 = vtanh.f32 %v1073_v5  ;;  %v2341_v5 = vld [vmem:[#allocation2 + $0x48] ss:$12 sps:$4 sm:$0xff]  }
 0x5e3   :  { %v2301_v43 = vpop.eup %2300 }
 0x5e4   :  { %v1076_v3 = vmul.f32 %v2301_v43, %v1075_v4 }
 0x5e6   :  { %v1079_v6 = vadd.f32 %v1078_v15, %v1076_v3  ;;  %v2340_v15 = vld [vmem:[#allocation2 + $0x4c] ss:$12 sps:$4 sm:$0xff]  }
 0x5e8   :  { %v2863_v51 = vpack.c.bf16 %v1079_v6, %v1079_v6 }
 0x5ea   :  { %1114 = vmatmul.mubr.bf16.vlgmr.msra.gmra.mrb[36].mxu0 %v2863_v51  ;;  %2072 = vmatmul.mubr.bf16.vlgmr.msra.gmra.mrb[32].mxu1 %v2863_v51  ;;  %v1182_v10 = vunpack.c.l.bf16 %v2863_v51 }
 0x5eb   :  { %1187 = vmatpush1.bf16.msra.mxu0 %v2494_v25  ;;  %2076 = vmatpush3.bf16.msra.mxu1 %v2544_v52 }
 0x5ec   :  { %1188 = vmatprep.subr.bf16.mxu0 %v2496_v28  ;;  %2077 = vmatprep.subr.bf16.mxu1 %v3017_v13 }
 0x5ed   :  { %1218 = vmatprep.mubr.bf16.mxu0 %v3016_v0  ;;  %2091 = vmatprep.mubr.msk.bf16.mxu1 %vm2399_vm10, %v3017_v13 }
 0x5ef   :  { %1189 = vmatpush1.bf16.msra.mxu0 %v2506_v34  ;;  %2078 = vmatpush3.bf16.msra.mxu1 %v2555_v55 }
 0x5f0   :  { %1190 = vmatprep.subr.bf16.mxu0 %v2510_v36  ;;  %2079 = vmatprep.subr.bf16.mxu1 %v3017_v13 }
 0x5f3   :  { %1191 = vmatpush1.bf16.msra.mxu0 %v2519_v42  ;;  %2080 = vmatpush3.bf16.msra.mxu1 %v2567_v58 }
 0x5f4   :  { %1192 = vmatprep.subr.bf16.mxu0 %v2522_v44  ;;  %2081 = vmatprep.subr.bf16.mxu1 %v3017_v13 }
 0x5f7   :  { %1193 = vmatpush1.bf16.msra.mxu0 %v2529_v46  ;;  %2082 = vmatpush3.bf16.msra.mxu1 %v2577_v60 }
 0x5f8   :  { %1194 = vmatprep.subr.bf16.mxu0 %v2533_v47  ;;  %2083 = vmatprep.subr.bf16.mxu1 %v3017_v13 }
 0x5fb   :  { %1195 = vmatpush1.bf16.msra.mxu0 %v2539_v49  ;;  %2084 = vmatpush3.bf16.msra.mxu1 %v2583_v61 }
 0x5fc   :  { %1196 = vmatprep.subr.bf16.mxu0 %v2542_v50  ;;  %2085 = vmatprep.subr.bf16.mxu1 %v3017_v13 }
 0x5ff   :  { %1197 = vmatpush1.bf16.msra.mxu0 %v2548_v53  ;;  %2086 = vmatpush3.bf16.msra.mxu1 %v2591_v62 }
 0x600   :  { %1198 = vmatprep.subr.bf16.mxu0 %v2552_v54  ;;  %2087 = vmatprep.subr.bf16.mxu1 %v3017_v13 }
 0x603   :  { %1199 = vmatpush1.bf16.msra.mxu0 %v2561_v56  ;;  %2088 = vmatpush3.bf16.msra.mxu1 %v2597_v63 }
 0x604   :  { %1200 = vmatprep.subr.bf16.mxu0 %v2564_v57  ;;  %2089 = vmatprep.subr.bf16.mxu1 %v3017_v13 }
 0x607   :  { %1201 = vmatpush1.bf16.msra.mxu0 %v2572_v59  ;;  %2090 = vmatpush3.bf16.msra.mxu1 %v2603_v1 }
 0x608   :  { %1291 = vmatprep.subr.bf16.mxu0 %v2854_v8  ;;  %2095 = vmatprep.subr.bf16.mxu1 %v3017_v13 }
 0x6bd   :  { %v1115_v25 = vpop.f32.mrb[36].mxu0  ;;  %v1156_v28 = vpop.f32.mrb[32].mxu1 }
 0x6be   :  { %v1162_v34 = vadd.f32 %v1115_v25, %v2667_v23  ;;  %v1117_v36 = vpop.f32.mrb[37].mxu0  ;;  %v2073_v42 = vpop.f32.mrb[33].mxu1  ;;  %v1176_v23 = vadd.f32 %v2682_v2, %v1156_v28 }
 0x6bf   :  { %v1169_v44 = vadd.f32 %v1117_v36, %v2669_v24  ;;  %v1119_v17 = vpop.f32.mrb[38].mxu0  ;;  %v1159_v7 = vpop.f32.mrb[34].mxu1  ;;  %v2228_v42 = vld [vmem:[#allocation4 + $0x10] sm:$0xff]  }
 0x6c0   :  { %v1794_v38 = vmul.f32 -1.442695, %v1162_v34  ;;  %v1120_v32 = vpop.f32.mrb[39].mxu0  ;;  %v2074_v48 = vpop.f32.mrb[35].mxu1  ;;  %v2231_v17 = vld [vmem:[#allocation4 + $0x28] sm:$0xff]   ;;  %v2232_v7 = vld [vmem:[#allocation4 + $0x30] sm:$0xff]  }
 0x6c1   :  { %v1795_v31 = vmul.f32 -1.442695, %v1169_v44  ;;  %v2229_v44 = vld [vmem:[#allocation4 + $0x18] sm:$0xff]   ;;  %v2234_v32 = vld [vmem:[#allocation4 + $0x40] sm:$0xff]   ;;  %v2235_v48 = vld [vmem:[#allocation4 + $0x48] sm:$0xff]  }
 0x6c2   :  { %2302 = vpow2.f32 %v1794_v38  ;;  %v2233_v38 = vld [vmem:[#allocation4 + $0x38] sm:$0xff]  }
 0x6c3   :  { %2304 = vpow2.f32 %v1795_v31 }
 0x6cc   :  { %v2303_v33 = vpop.eup %2302 }
 0x6cd   :  { %v2305_v8 = vpop.eup %2304  ;;  %v1166_v11 = vadd.f32 1.0, %v2303_v33 }
 0x6ce   :  { %v1173_v35 = vadd.f32 1.0, %v2305_v8 }
 0x6cf   :  { %2306 = vrcp.f32 %v1166_v11 }
 0x6d0   :  { %2308 = vrcp.f32 %v1173_v35 }
 0x6d9   :  { %v2307_v37 = vpop.eup %2306 }
 0x6da   :  { %v2309_v24 = vpop.eup %2308  ;;  %v1177_v12 = vmul.f32 %v2307_v37, %v1176_v23 }
 0x6db   :  { %v1183_v9 = vmul.f32 %v2309_v24, %v1182_v10  ;;  %v1180_v39 = vsub.f32 1.0, %v2309_v24 }
 0x6dc   :  { %v1178_v16 = vadd.f32 %v1177_v12, %v2661_v20  ;;  %v2339_v20 = vld [vmem:[#allocation2 + $0x30] ss:$12 sps:$4 sm:$0xff]  }
 0x6de   :  { %2310 = vtanh.f32 %v1178_v16 }
 0x6e8   :  { %v2311_v45 = vpop.eup %2310 }
 0x6e9   :  { %v1181_v21 = vmul.f32 %v2311_v45, %v1180_v39 }
 0x6eb   :  { %v1184_v18 = vadd.f32 %v1183_v9, %v1181_v21 }
 0x6ed   :  { %v2907_v40 = vpack.c.bf16 %v1184_v18, %v1184_v18 }
 0x6ef   :  { %1219 = vmatmul.mubr.bf16.vlgmr.msra.gmra.mrb[40].mxu0 %v2907_v40  ;;  %2092 = vmatmul.mubr.bf16.vlgmr.msra.gmra.mrb[36].mxu1 %v2907_v40  ;;  %v1287_v4 = vunpack.c.l.bf16 %v2907_v40 }
 0x6f0   :  { %1292 = vmatpush1.bf16.msra.mxu0 %v2337_v22  ;;  %2096 = vmatpush3.bf16.msra.mxu1 %v2544_v52  ;;  %v2342_v52 = vld [vmem:[#allocation2 + $0x64] ss:$12 sps:$4 sm:$0xff]  }
 0x6f1   :  { %1293 = vmatprep.subr.bf16.mxu0 %v2338_v41  ;;  %2097 = vmatprep.subr.bf16.mxu1 %v3017_v13 }
 0x6f2   :  { %1323 = vmatprep.mubr.bf16.mxu0 %v3016_v0  ;;  %2111 = vmatprep.mubr.msk.bf16.mxu1 %vm2399_vm10, %v3017_v13 }
 0x6f4   :  { %1294 = vmatpush1.bf16.msra.mxu0 %v2339_v20  ;;  %2098 = vmatpush3.bf16.msra.mxu1 %v2555_v55 }
 0x6f5   :  { %1295 = vmatprep.subr.bf16.mxu0 %v2340_v15  ;;  %2099 = vmatprep.subr.bf16.mxu1 %v3017_v13 }
 0x6f8   :  { %1296 = vmatpush1.bf16.msra.mxu0 %v2341_v5  ;;  %2100 = vmatpush3.bf16.msra.mxu1 %v2567_v58 }
 0x6f9   :  { %1297 = vmatprep.subr.bf16.mxu0 %v2342_v52  ;;  %2101 = vmatprep.subr.bf16.mxu1 %v3017_v13 }
 0x6fc   :  { %1298 = vmatpush1.bf16.msra.mxu0 %v2529_v46  ;;  %2102 = vmatpush3.bf16.msra.mxu1 %v2577_v60 }
 0x6fd   :  { %1299 = vmatprep.subr.bf16.mxu0 %v2533_v47  ;;  %2103 = vmatprep.subr.bf16.mxu1 %v3017_v13 }
 0x700   :  { %1300 = vmatpush1.bf16.msra.mxu0 %v2539_v49  ;;  %2104 = vmatpush3.bf16.msra.mxu1 %v2583_v61 }
 0x701   :  { %1301 = vmatprep.subr.bf16.mxu0 %v2542_v50  ;;  %2105 = vmatprep.subr.bf16.mxu1 %v3017_v13 }
 0x704   :  { %1302 = vmatpush1.bf16.msra.mxu0 %v2548_v53  ;;  %2106 = vmatpush3.bf16.msra.mxu1 %v2591_v62 }
 0x705   :  { %1303 = vmatprep.subr.bf16.mxu0 %v2552_v54  ;;  %2107 = vmatprep.subr.bf16.mxu1 %v3017_v13 }
 0x708   :  { %1304 = vmatpush1.bf16.msra.mxu0 %v2561_v56  ;;  %2108 = vmatpush3.bf16.msra.mxu1 %v2597_v63 }
 0x709   :  { %1305 = vmatprep.subr.bf16.mxu0 %v2564_v57  ;;  %2109 = vmatprep.subr.bf16.mxu1 %v3017_v13 }
 0x70c   :  { %1306 = vmatpush1.bf16.msra.mxu0 %v2572_v59  ;;  %2110 = vmatpush3.bf16.msra.mxu1 %v2603_v1 }
 0x70d   :  { %2115 = vmatprep.subr.bf16.mxu1 %v3017_v13  ;;  %2135 = vmatprep.subr.bf16.mxu0 %v3017_v13 }
 0x7c2   :  { %v1220_v46 = vpop.f32.mrb[40].mxu0  ;;  %v1261_v47 = vpop.f32.mrb[36].mxu1 }
 0x7c3   :  { %v1267_v49 = vadd.f32 %v1220_v46, %v2671_v26  ;;  %v1222_v50 = vpop.f32.mrb[41].mxu0  ;;  %v2093_v53 = vpop.f32.mrb[37].mxu1  ;;  %v1281_v26 = vadd.f32 %v2682_v2, %v1261_v47 }
 0x7c4   :  { %v1274_v54 = vadd.f32 %v1222_v50, %v2673_v27  ;;  %v1224_v55 = vpop.f32.mrb[42].mxu0  ;;  %v1264_v56 = vpop.f32.mrb[38].mxu1  ;;  %v2236_v50 = vld [vmem:[#allocation4 + $0x50] sm:$0xff]   ;;  %v2237_v53 = vld [vmem:[#allocation4 + $0x58] sm:$0xff]  }
 0x7c5   :  { %v1796_v57 = vmul.f32 -1.442695, %v1267_v49  ;;  %v1225_v58 = vpop.f32.mrb[43].mxu0  ;;  %v2094_v60 = vpop.f32.mrb[39].mxu1  ;;  %v2241_v55 = vld [vmem:[#allocation4 + $0x78] sm:$0xff]   ;;  %v2242_v56 = vld [vmem:[#allocation4 + $0x80] sm:$0xff]  }
 0x7c6   :  { %v1797_v59 = vmul.f32 -1.442695, %v1274_v54  ;;  %v2240_v54 = vld [vmem:[#allocation4 + $0x70] sm:$0xff]   ;;  %v3018_v58 = vlaneseq }
 0x7c7   :  { %2312 = vpow2.f32 %v1796_v57  ;;  %v2243_v57 = vld [vmem:[#allocation4 + $0x88] sm:$0xff]  }
 0x7c8   :  { %2314 = vpow2.f32 %v1797_v59  ;;  %v1397_v60 = vshrl.u32 %v3018_v58, 7 }
 0x7ca   :  { %vm1398_vm12 = vcmp.lt.s32.totalorder %v1397_v60, 4 }
 0x7cb   :  { %v2970_v59 = vsel %vm1398_vm12, 1.0, %v3017_v13 }
 0x7d1   :  { %v2313_v61 = vpop.eup %2312 }
 0x7d2   :  { %v2315_v62 = vpop.eup %2314  ;;  %v1271_v63 = vadd.f32 1.0, %v2313_v61 }
 0x7d3   :  { %v1278_v1 = vadd.f32 1.0, %v2315_v62 }
 0x7d4   :  { %2316 = vrcp.f32 %v1271_v63 }
 0x7d5   :  { %2318 = vrcp.f32 %v1278_v1 }
 0x7de   :  { %v2317_v0 = vpop.eup %2316 }
 0x7df   :  { %v2319_v27 = vpop.eup %2318  ;;  %v1282_v43 = vmul.f32 %v2317_v0, %v1281_v26 }
 0x7e0   :  { %v1288_v3 = vmul.f32 %v2319_v27, %v1287_v4  ;;  %v1285_v51 = vsub.f32 1.0, %v2319_v27 }
 0x7e1   :  { %v1283_v6 = vadd.f32 %v2651_v14, %v1282_v43  ;;  %v2230_v14 = vld [vmem:[#allocation4 + $0x20] sm:$0xff]  }
 0x7e3   :  { %2320 = vtanh.f32 %v1283_v6 }
 0x7ed   :  { %v2321_v25 = vpop.eup %2320 }
 0x7ee   :  { %v1286_v28 = vmul.f32 %v2321_v25, %v1285_v51 }
 0x7f0   :  { %v1289_v34 = vadd.f32 %v1288_v3, %v1286_v28 }
 0x7f2   :  { %v1290_v36 = vpack.c.bf16 %v1289_v34, %v1289_v34 }
 0x7f4   :  { %1324 = vmatmul.mubr.bf16.vlgmr.msra.gmra.mrb[44].mxu0 %v1290_v36  ;;  %2112 = vmatmul.mubr.bf16.vlgmr.msra.gmra.mrb[40].mxu1 %v1290_v36  ;;  %v1392_v22 = vunpack.c.l.bf16 %v1290_v36 }
 0x7f5   :  { %2131 = vmatprep.mubr.msk.bf16.mxu1 %vm2399_vm10, %v3017_v13  ;;  %2151 = vmatprep.mubr.msk.bf16.mxu0 %vm2399_vm10, %v3017_v13 }
 0x7f6   :  { %2116 = vmatpush3.bf16.msra.mxu1 %v2228_v42  ;;  %2136 = vmatpush3.bf16.msra.mxu0 %v2236_v50 }
 0x7f7   :  { %2117 = vmatprep.subr.bf16.mxu1 %v3017_v13  ;;  %2137 = vmatprep.subr.bf16.mxu0 %v3017_v13 }
 0x7fa   :  { %2118 = vmatpush3.bf16.msra.mxu1 %v2229_v44  ;;  %2138 = vmatpush3.bf16.msra.mxu0 %v2237_v53 }
 0x7fb   :  { %2119 = vmatprep.subr.bf16.mxu1 %v3017_v13  ;;  %2139 = vmatprep.subr.bf16.mxu0 %v3017_v13 }
 0x7fe   :  { %2120 = vmatpush3.bf16.msra.mxu1 %v2230_v14 }
 0x7ff   :  { %2121 = vmatprep.subr.bf16.mxu1 %v3017_v13 }
 0x802   :  { %2122 = vmatpush3.bf16.msra.mxu1 %v2231_v17 }
 0x803   :  { %2123 = vmatprep.subr.bf16.mxu1 %v3017_v13 }
 0x806   :  { %2124 = vmatpush3.bf16.msra.mxu1 %v2232_v7 }
 0x807   :  { %2125 = vmatprep.subr.bf16.mxu1 %v3017_v13 }
 0x80a   :  { %2126 = vmatpush3.bf16.msra.mxu1 %v2233_v38 }
 0x80b   :  { %2127 = vmatprep.subr.bf16.mxu1 %v3017_v13 }
 0x80e   :  { %2128 = vmatpush3.bf16.msra.mxu1 %v2234_v32 }
 0x80f   :  { %2129 = vmatprep.subr.bf16.mxu1 %v3017_v13 }
 0x812   :  { %2130 = vmatpush3.bf16.msra.mxu1 %v2235_v48 }
 0x8c7   :  { %v1325_v31 = vpop.f32.mrb[44].mxu0  ;;  %v1366_v33 = vpop.f32.mrb[40].mxu1 }
 0x8c8   :  { %v1372_v8 = vadd.f32 %v1325_v31, %v2675_v29  ;;  %v1327_v11 = vpop.f32.mrb[45].mxu0  ;;  %v2113_v35 = vpop.f32.mrb[41].mxu1  ;;  %v1386_v29 = vadd.f32 %v2682_v2, %v1366_v33  ;;  %v2238_v2 = vld [vmem:[#allocation4 + $0x60] sm:$0xff]   ;;  %v1808_v33 = vld [vmem:[%s3009_s3 + $0x1] ss:$0 sm:$0xff] }
 0x8c9   :  { %v1379_v23 = vadd.f32 %v1327_v11, %v2677_v30  ;;  %v1329_v37 = vpop.f32.mrb[46].mxu0  ;;  %v1369_v10 = vpop.f32.mrb[42].mxu1  ;;  %2140 = vmatpush3.bf16.msra.mxu0 %v2238_v2  ;;  %v1809_v11 = vld [vmem:[%s3009_s3 + $0x2] ss:$0 sm:$0xff] }
 0x8ca   :  { %v1798_v24 = vmul.f32 -1.442695, %v1372_v8  ;;  %v1330_v12 = vpop.f32.mrb[47].mxu0  ;;  %v2114_v9 = vpop.f32.mrb[43].mxu1  ;;  %2141 = vmatprep.subr.bf16.mxu0 %v3017_v13  ;;  %v2244_v10 = vld [vmem:[#allocation4 + $0x90] sm:$0xff]  }
 0x8cb   :  { %v1799_v16 = vmul.f32 -1.442695, %v1379_v23  ;;  %v2246_v12 = vld [vmem:[#allocation4 + $0xa0] sm:$0xff]   ;;  %v2247_v9 = vld [vmem:[#allocation4 + $0xa8] sm:$0xff]  }
 0x8cc   :  { %2322 = vpow2.f32 %v1798_v24  ;;  %v2245_v24 = vld [vmem:[#allocation4 + $0x98] sm:$0xff]  }
 0x8cd   :  { %2324 = vpow2.f32 %v1799_v16  ;;  %v2248_v16 = vld [vmem:[#allocation4 + $0xb0] sm:$0xff]  }
 0x8d6   :  { %v2323_v39 = vpop.eup %2322 }
 0x8d7   :  { %v2325_v45 = vpop.eup %2324  ;;  %v1376_v21 = vadd.f32 1.0, %v2323_v39  ;;  %v2249_v39 = vld [vmem:[#allocation4 + $0xb8] sm:$0xff]  }
 0x8d8   :  { %v1383_v18 = vadd.f32 1.0, %v2325_v45  ;;  %v2250_v45 = vld [vmem:[#allocation4 + $0xc0] sm:$0xff]  }
 0x8d9   :  { %2326 = vrcp.f32 %v1376_v21  ;;  %v2251_v21 = vld [vmem:[#allocation4 + $0xc8] sm:$0xff]  }
 0x8da   :  { %2328 = vrcp.f32 %v1383_v18  ;;  %v1810_v18 = vld [vmem:[%s3009_s3 + $0x3] ss:$0 sm:$0xff] }
 0x8e3   :  { %v2327_v40 = vpop.eup %2326 }
 0x8e4   :  { %v2329_v41 = vpop.eup %2328  ;;  %v1387_v30 = vmul.f32 %v2327_v40, %v1386_v29 }
 0x8e5   :  { %v1393_v20 = vmul.f32 %v2329_v41, %v1392_v22  ;;  %v1390_v5 = vsub.f32 1.0, %v2329_v41 }
 0x8e6   :  { %v1388_v15 = vadd.f32 %v2659_v19, %v1387_v30  ;;  %v2239_v19 = vld [vmem:[#allocation4 + $0x68] sm:$0xff]  }
 0x8e7   :  { %2142 = vmatpush3.bf16.msra.mxu0 %v2239_v19 }
 0x8e8   :  { %2330 = vtanh.f32 %v1388_v15  ;;  %2143 = vmatprep.subr.bf16.mxu0 %v3017_v13 }
 0x8eb   :  { %2144 = vmatpush3.bf16.msra.mxu0 %v2240_v54 }
 0x8ec   :  { %2145 = vmatprep.subr.bf16.mxu0 %v3017_v13 }
 0x8ef   :  { %2146 = vmatpush3.bf16.msra.mxu0 %v2241_v55 }
 0x8f0   :  { %2147 = vmatprep.subr.bf16.mxu0 %v3017_v13 }
 0x8f2   :  { %v2331_v52 = vpop.eup %2330 }
 0x8f3   :  { %v1391_v46 = vmul.f32 %v2331_v52, %v1390_v5  ;;  %2148 = vmatpush3.bf16.msra.mxu0 %v2242_v56 }
 0x8f4   :  { %2149 = vmatprep.subr.bf16.mxu0 %v3017_v13 }
 0x8f5   :  { %v1394_v47 = vadd.f32 %v1393_v20, %v1391_v46 }
 0x8f7   :  { %v1395_v49 = vpack.c.bf16 %v1394_v47, %v1394_v47  ;;  %2150 = vmatpush3.bf16.msra.mxu0 %v2243_v57 }
 0x8f8   :  { %2155 = vmatprep.subr.bf16.mxu0 %v3017_v13 }
 0x8f9   :  { %2132 = vmatmul.mubr.bf16.vlgmr.msra.gmra.mrb[8].mxu1 %v1395_v49 }
 0x9cc   :  { %v1482_v61 = vpop.f32.mrb[8].mxu1 }
 0x9cd   :  { %v1488_v62 = vmax.f32 %v1482_v61, 0.0  ;;  %v2133_v63 = vpop.f32.mrb[9].mxu1 }
 0x9ce   :  { %v1485_v1 = vpop.f32.mrb[10].mxu1 }
 0x9cf   :  { %v1489_v26 = vmul.f32 %v1488_v62, %v2970_v59  ;;  %v2134_v0 = vpop.f32.mrb[11].mxu1  ;;  %v1819_v1 = vld [vmem:[%s3009_s3 + $0x4] ss:$0 sm:$0xff] }
 0x9d1   :  { %v1490_v4 = vrot.slane %v1489_v26, 4 }
 0x9d3   :  { %v1491_v27 = vadd.f32 %v1490_v4, %v1489_v26 }
 0x9d5   :  { %v1492_v43 = vrot.slane %v1491_v27, 2 }
 0x9d7   :  { %v1493_v3 = vadd.f32 %v1492_v43, %v1491_v27  ;;  %v1821_v43 = vld [vmem:[%s3009_s3 + $0x6] ss:$0 sm:$0xff] }
 0x9d9   :  { %v1494_v6 = vrot.slane %v1493_v3, 1 }
 0x9db   :  { %v1495_v51 = vadd.f32 %v1494_v6, %v1493_v3 }
 0x9dd   :  { %v1496_v25 = vmul.f32 0.25, %v1495_v51 }
 0x9df   :  { %v1497_v28 = vsub.f32 %v1488_v62, %v1496_v25 }
 0x9e1   :  { %v1498_v34 = vmul.f32 %v1497_v28, %v2970_v59 }
 0x9e3   :  { %v1499_v36 = vmul.f32 %v1498_v34, %v1498_v34 }
 0x9e5   :  { %v1500_v42 = vrot.slane %v1499_v36, 4 }
 0x9e7   :  { %v1501_v44 = vadd.f32 %v1500_v42, %v1499_v36 }
 0x9e9   :  { %v1502_v14 = vrot.slane %v1501_v44, 2 }
 0x9eb   :  { %v1503_v17 = vadd.f32 %v1502_v14, %v1501_v44 }
 0x9ed   :  { %v1504_v7 = vrot.slane %v1503_v17, 1 }
 0x9ef   :  { %v1505_v38 = vadd.f32 %v1504_v7, %v1503_v17 }
 0x9f1   :  { %v1506_v32 = vmul.f32 0.25, %v1505_v38 }
 0x9f3   :  { %v1507_v48 = vadd.f32 1e-05, %v1506_v32 }
 0x9f5   :  { %2332 = vrsqrt.f32 %v1507_v48 }
 0x9ff   :  { %v2333_v31 = vpop.eup %2332 }
 0xa00   :  { %v1509_v8 = vmul.f32 %v2333_v31, %v1497_v28 }
 0xa02   :  { %v1514_v35 = vmul.f32 %v1808_v33, %v1509_v8 }
 0xa04   :  { %v1519_v23 = vadd.f32 %v1809_v11, %v1514_v35 }
 0xa06   :  { %v1520_v37 = vpack.c.bf16 %v1519_v23, %v1519_v23 }
 0xa08   :  { %2152 = vmatmul.mubr.bf16.vlgmr.msra.gmra.mrb[48].mxu0 %v1520_v37 }
 0xa09   :  { %2171 = vmatprep.mubr.msk.bf16.mxu0 %vm2399_vm10, %v3017_v13  ;;  %2156 = vmatpush3.bf16.msra.mxu0 %v2244_v10 }
 0xa0a   :  { %2157 = vmatprep.subr.bf16.mxu0 %v3017_v13 }
 0xa0d   :  { %2158 = vmatpush3.bf16.msra.mxu0 %v2245_v24 }
 0xa0e   :  { %2159 = vmatprep.subr.bf16.mxu0 %v3017_v13 }
 0xa11   :  { %2160 = vmatpush3.bf16.msra.mxu0 %v2246_v12 }
 0xa12   :  { %2161 = vmatprep.subr.bf16.mxu0 %v3017_v13 }
 0xa15   :  { %2162 = vmatpush3.bf16.msra.mxu0 %v2247_v9 }
 0xa16   :  { %2163 = vmatprep.subr.bf16.mxu0 %v3017_v13 }
 0xa19   :  { %2164 = vmatpush3.bf16.msra.mxu0 %v2248_v16 }
 0xa1a   :  { %2165 = vmatprep.subr.bf16.mxu0 %v3017_v13 }
 0xa1d   :  { %2166 = vmatpush3.bf16.msra.mxu0 %v2249_v39 }
 0xa1e   :  { %2167 = vmatprep.subr.bf16.mxu0 %v3017_v13 }
 0xa21   :  { %2168 = vmatpush3.bf16.msra.mxu0 %v2250_v45 }
 0xa22   :  { %2169 = vmatprep.subr.bf16.mxu0 %v3017_v13 }
 0xa25   :  { %2170 = vmatpush3.bf16.msra.mxu0 %v2251_v21 }
 0xadb   :  { %v1607_v29 = vpop.f32.mrb[48].mxu0 }
 0xadc   :  { %v1608_v40 = vadd.f32 %v1810_v18, %v1607_v29  ;;  %v2153_v22 = vpop.f32.mrb[49].mxu0 }
 0xadd   :  { %v1610_v41 = vpop.f32.mrb[50].mxu0 }
 0xade   :  { %v1613_v30 = vmax.f32 %v1608_v40, 0.0  ;;  %v2154_v20 = vpop.f32.mrb[51].mxu0 }
 0xae0   :  { %v1614_v15 = vmul.f32 %v1613_v30, %v2970_v59 }
 0xae2   :  { %v1615_v5 = vrot.slane %v1614_v15, 4 }
 0xae4   :  { %v1616_v52 = vadd.f32 %v1615_v5, %v1614_v15 }
 0xae6   :  { %v1617_v46 = vrot.slane %v1616_v52, 2 }
 0xae8   :  { %v1618_v47 = vadd.f32 %v1617_v46, %v1616_v52 }
 0xaea   :  { %v1619_v49 = vrot.slane %v1618_v47, 1 }
 0xaec   :  { %v1620_v13 = vadd.f32 %v1619_v49, %v1618_v47 }
 0xaee   :  { %v1621_v50 = vmul.f32 0.25, %v1620_v13 }
 0xaf0   :  { %v1622_v53 = vsub.f32 %v1613_v30, %v1621_v50 }
 0xaf2   :  { %v1623_v2 = vmul.f32 %v1622_v53, %v2970_v59  ;;  %v1820_v59 = vld [vmem:[%s3009_s3 + $0x5] ss:$0 sm:$0xff] }
 0xaf4   :  { %v1624_v19 = vmul.f32 %v1623_v2, %v1623_v2 }
 0xaf6   :  { %v1625_v54 = vrot.slane %v1624_v19, 4 }
 0xaf8   :  { %v1626_v55 = vadd.f32 %v1625_v54, %v1624_v19 }
 0xafa   :  { %v1627_v56 = vrot.slane %v1626_v55, 2 }
 0xafc   :  { %v1628_v57 = vadd.f32 %v1627_v56, %v1626_v55 }
 0xafe   :  { %v1629_v58 = vrot.slane %v1628_v57, 1 }
 0xb00   :  { %v1630_v60 = vadd.f32 %v1629_v58, %v1628_v57 }
 0xb02   :  { %v1631_v61 = vmul.f32 0.25, %v1630_v60 }
 0xb04   :  { %v1632_v62 = vadd.f32 1e-05, %v1631_v61 }
 0xb06   :  { %2334 = vrsqrt.f32 %v1632_v62 }
 0xb10   :  { %v2335_v63 = vpop.eup %2334 }
 0xb11   :  { %v1634_v26 = vmul.f32 %v2335_v63, %v1622_v53 }
 0xb13   :  { %v1639_v0 = vmul.f32 %v1819_v1, %v1634_v26 }
 0xb15   :  { %v1644_v4 = vadd.f32 %v1820_v59, %v1639_v0 }
 0xb17   :  { %v1645_v27 = vpack.c.bf16 %v1644_v4, %v1644_v4 }
 0xb19   :  { %2172 = vmatmul.mubr.bf16.vlgmr.msra.gmra.mrb[52].mxu0 %v1645_v27 }
 0xbec   :  { %v1732_v3 = vpop.f32.mrb[52].mxu0 }
 0xbed   :  { %v1733_v6 = vadd.f32 %v1821_v43, %v1732_v3  ;;  %v2173_v51 = vpop.f32.mrb[53].mxu0 }
 0xbee   :  { %v1735_v25 = vpop.f32.mrb[54].mxu0 }
 0xbef   :  { %1738 = vst [vmem:[%s3010_s4] sm:$0xff] %v1733_v6  ;;  %v2174_v28 = vpop.f32.mrb[55].mxu0 }
 0xbf0   :  { %1743 = vsyncpa [#allocation3], 1 }
 0xbf1   :  { %1744 = vsyncpa [#allocation5], 1 }

</bundles_post_ra>
